<compile_context>
chip_gen: v6e
topology: v6e:2x2x1
jax: 0.10.0
libtpu: 0.0.40
codegen_flags: <defaults>
</compile_context>

<pallas_src>
import functools

import jax
import jax.numpy as jnp
from jax.experimental import pallas as pl
from jax.experimental.pallas import tpu as pltpu


_LANE = 128
_SUBLANE = 8
_MAX_BLOCK_B = 1024


def _round_up(x, m):
    return (x + m - 1) // m * m


_VMEM_CACHE = {}


def _vmem_budget_and_limit():
    """~70% of per-core VMEM as the tiling budget, ~85% as the scoped-VMEM limit."""
    if "v" not in _VMEM_CACHE:
        try:
            cap = int(getattr(pltpu.get_tpu_info(), "vmem_capacity_bytes", 0) or 0)
        except Exception:
            cap = 0
        if cap <= 0:
            cap = 64 * 1024 * 1024               # conservative fallback (v7x per-TC size)
        cap = max(min(cap, 128 * 1024 * 1024), 32 * 1024 * 1024)
        _VMEM_CACHE["v"] = (int(cap * 0.70), int(cap * 0.85))
    return _VMEM_CACHE["v"]


# ----------------------------------------------------------------------------
# Fused VAE forward kernel
# ----------------------------------------------------------------------------
def _make_vae_kernel(n_enc, n_dec, d_in, d_latent, d_in_p, d_latent_p, compute_dtype):
    def kernel(*refs):
        # inputs: x, noise, enc_W/b..., head_W/b (mu|log_sigma fused), dec_W/b...
        # outputs: recon (lane-padded), head = mu|log_sigma (lane-padded, fused)
        # scratch: lane-pad buffers for x and noise
        idx = 0
        x_ref = refs[idx]; idx += 1
        eps_ref = refs[idx]; idx += 1
        enc = [(refs[idx + 2 * i], refs[idx + 2 * i + 1]) for i in range(n_enc)]
        idx += 2 * n_enc
        head_w_ref, head_b_ref = refs[idx], refs[idx + 1]
        idx += 2
        dec = [(refs[idx + 2 * i], refs[idx + 2 * i + 1]) for i in range(n_dec)]
        idx += 2 * n_dec
        recon_ref, head_out_ref = refs[idx], refs[idx + 1]
        xpad_ref, epspad_ref = refs[idx + 2], refs[idx + 3]

        def linear(h, w_ref, b_ref, relu):
            # bf16 MXU matmul with f32 accumulation; bias add / relu in f32 on the VPU.
            w = w_ref[...]
            acc = jnp.dot(h.astype(w.dtype), w, preferred_element_type=jnp.float32)
            acc = acc + b_ref[...]
            if relu:
                acc = jnp.maximum(acc, 0.0)
            return acc

        # ---- lane-pad x inside VMEM (padded lanes carry exact zeros everywhere) ----
        if d_in != d_in_p:
            xpad_ref[...] = jnp.zeros_like(xpad_ref)
            xpad_ref[:, :d_in] = x_ref[...].astype(compute_dtype)
            h = xpad_ref[...]
        else:
            h = x_ref[...].astype(compute_dtype)

        # ---- encoder MLP (relu on all but the last layer) ----
        for i, (w, b) in enumerate(enc):
            h = linear(h, w, b, relu=i < n_enc - 1).astype(compute_dtype)

        # ---- fused mu | log_sigma head: one matmul, lane-aligned split ----
        head = linear(h, head_w_ref, head_b_ref, relu=False)          # f32
        mu = head[:, :d_latent_p]
        log_sigma = head[:, d_latent_p:]

        # ---- reparametrize: z = mu + exp(log_sigma) * eps  (f32 on VPU/EUP) ----
        if d_latent != d_latent_p:
            epspad_ref[...] = jnp.zeros_like(epspad_ref)
            epspad_ref[:, :d_latent] = eps_ref[...].astype(jnp.float32)
            eps = epspad_ref[...]
        else:
            eps = eps_ref[...].astype(jnp.float32)
        z = mu + jnp.exp(log_sigma) * eps

        # ---- decoder MLP ----
        h = z.astype(compute_dtype)
        for i, (w, b) in enumerate(dec):
            h = linear(h, w, b, relu=i < n_dec - 1)
            if i < n_dec - 1:
                h = h.astype(compute_dtype)

        recon_ref[...] = h.astype(recon_ref.dtype)
        head_out_ref[...] = head.astype(head_out_ref.dtype)

    return kernel


# ----------------------------------------------------------------------------
# Parameter init (deterministic, matches torch.nn.Linear default U(-k, k)).
# Weights stored as [d_in, d_out] (transposed vs torch's [out, in]).
# ----------------------------------------------------------------------------
def _init_linear(key, d_in, d_out):
    kw, kb = jax.random.split(key)
    k = 1.0 / jnp.sqrt(jnp.float32(d_in))
    w = jax.random.uniform(kw, (d_in, d_out), jnp.float32, -k, k)
    b = jax.random.uniform(kb, (d_out,), jnp.float32, -k, k)
    return w, b


def _mlp_dims(num_layers, d_in, d_hidden, d_out):
    return [(d_in if i == 0 else d_hidden,
             d_out if i == num_layers - 1 else d_hidden)
            for i in range(num_layers)]


def init_vae_params(key, num_encoder_layers, num_decoder_layers, d_in, d_hidden, d_latent):
    params = {"encoder": [], "decoder": []}
    for (di, do) in _mlp_dims(num_encoder_layers, d_in, d_hidden, d_latent):
        key, sub = jax.random.split(key)
        params["encoder"].append(_init_linear(sub, di, do))
    key, sub = jax.random.split(key)
    params["mu"] = _init_linear(sub, d_latent, d_latent)
    key, sub = jax.random.split(key)
    params["log_sigma"] = _init_linear(sub, d_latent, d_latent)
    for (di, do) in _mlp_dims(num_decoder_layers, d_latent, d_hidden, d_in):
        key, sub = jax.random.split(key)
        params["decoder"].append(_init_linear(sub, di, do))
    return params


# ----------------------------------------------------------------------------
# One-time parameter preparation: pad to lane-aligned shapes, fuse mu|log_sigma
# head, cast matmul weights to the MXU input dtype (bf16 by default).
# ----------------------------------------------------------------------------
def prepare_vae_params(params, *, matmul_dtype=jnp.bfloat16):
    def pad_linear(w, b):
        di, do = w.shape
        di_p, do_p = _round_up(di, _LANE), _round_up(do, _LANE)
        wp = jnp.zeros((di_p, do_p), matmul_dtype).at[:di, :do].set(w.astype(matmul_dtype))
        bp = jnp.zeros((1, do_p), jnp.float32).at[0, :do].set(b.astype(jnp.float32))
        return wp, bp

    enc = [pad_linear(w, b) for w, b in params["encoder"]]
    dec = [pad_linear(w, b) for w, b in params["decoder"]]

    mu_w, mu_b = params["mu"]
    ls_w, ls_b = params["log_sigma"]
    dl = mu_w.shape[0]
    dl_p = _round_up(dl, _LANE)
    head_w = jnp.zeros((dl_p, 2 * dl_p), matmul_dtype)
    head_w = head_w.at[:dl, :dl].set(mu_w.astype(matmul_dtype))
    head_w = head_w.at[:dl, dl_p:dl_p + dl].set(ls_w.astype(matmul_dtype))
    head_b = jnp.zeros((1, 2 * dl_p), jnp.float32)
    head_b = head_b.at[0, :dl].set(mu_b.astype(jnp.float32))
    head_b = head_b.at[0, dl_p:dl_p + dl].set(ls_b.astype(jnp.float32))

    return {"encoder": enc, "head": (head_w, head_b), "decoder": dec}


# ----------------------------------------------------------------------------
# VMEM budgeting for the batch tile
# ----------------------------------------------------------------------------
def _vmem_estimate_bytes(block_b, d_in, d_latent, d_in_p, d_latent_p, d_max_p,
                         weight_bytes, weight_buffers, out_itemsize, compute_itemsize):
    f32 = 4
    in_tiles = 2 * block_b * (d_in + d_latent) * f32                      # x + eps, double-buffered
    out_tiles = 2 * block_b * (d_in_p + 2 * d_latent_p) * out_itemsize    # recon + head, double-buffered
    scratch = block_b * (d_in_p * compute_itemsize + d_latent_p * f32)    # lane-pad scratch
    interm = 4 * block_b * d_max_p * f32                                  # live activations / MXU staging
    return in_tiles + out_tiles + scratch + interm + weight_buffers * weight_bytes


def _const_spec(shape, single_buffer):
    """Whole-array BlockSpec with a constant index_map -> stays VMEM-resident."""
    zeros = (0,) * len(shape)
    index_map = lambda i: zeros
    if single_buffer:
        # Block index never changes -> one VMEM buffer is enough (no double-buffering).
        return pl.BlockSpec(shape, index_map, pipeline_mode=pl.Buffered(1))
    return pl.BlockSpec(shape, index_map)


# ----------------------------------------------------------------------------
# Wrapper calling pallas_call
# ----------------------------------------------------------------------------
@functools.partial(jax.jit,
                   static_argnames=("compute_dtype", "out_dtype", "single_buffer_weights"))
def vae_forward(x, noise, prepared, *, compute_dtype=jnp.bfloat16,
                out_dtype=jnp.bfloat16, single_buffer_weights=True):
    B, d_in = x.shape
    d_latent = noise.shape[1]
    d_in_p = _round_up(d_in, _LANE)
    d_latent_p = _round_up(d_latent, _LANE)

    n_enc = len(prepared["encoder"])
    n_dec = len(prepared["decoder"])
    layers = list(prepared["encoder"]) + [prepared["head"]] + list(prepared["decoder"])

    weight_bytes = sum(w.size * w.dtype.itemsize + b.size * b.dtype.itemsize
                       for w, b in layers)
    d_max_p = max([w.shape[1] for w, _ in layers] + [d_in_p, 2 * d_latent_p])
    weight_buffers = 1 if single_buffer_weights else 2
    out_itemsize = jnp.dtype(out_dtype).itemsize
    compute_itemsize = jnp.dtype(compute_dtype).itemsize

    vmem_budget, vmem_limit = _vmem_budget_and_limit()
    if weight_buffers * weight_bytes > vmem_budget:
        # TODO(synk): hidden-dim-tiled (reduction-axis) grid fallback for huge MLPs.
        raise NotImplementedError(
            "VAE weights exceed the per-core VMEM budget; hidden-dim tiling fallback "
            "is not implemented.")

    # Batch tile: largest that fits the budget (cap 1024 rows, multiple of 8 sublanes).
    block_b = min(_round_up(B, _SUBLANE), _MAX_BLOCK_B)
    if B >= 2 * _SUBLANE:
        # Keep >= 2 grid steps so megacore / dual-TC parts can shard the batch axis.
        block_b = min(block_b, _round_up(pl.cdiv(B, 2), _SUBLANE))
    while (block_b > _SUBLANE and
           _vmem_estimate_bytes(block_b, d_in, d_latent, d_in_p, d_latent_p, d_max_p,
                                weight_bytes, weight_buffers, out_itemsize,
                                compute_itemsize) > vmem_budget):
        block_b = max(_SUBLANE, _round_up(block_b // 2, _SUBLANE))

    B_pad = _round_up(B, block_b)
    if B_pad != B:
        # Only batch rows are padded; feature lanes stream unpadded (padded in-kernel).
        x = jnp.pad(x, ((0, B_pad - B), (0, 0)))
        noise = jnp.pad(noise, ((0, B_pad - B), (0, 0)))

    flat_inputs = [x.astype(jnp.float32), noise.astype(jnp.float32)]
    in_specs = [
        pl.BlockSpec((block_b, d_in), lambda i: (i, 0)),      # last dim == full dim -> legal
        pl.BlockSpec((block_b, d_latent), lambda i: (i, 0)),
    ]
    for w, b in layers:
        flat_inputs += [w, b]
        in_specs += [_const_spec(w.shape, single_buffer_weights),
                     _const_spec(b.shape, single_buffer_weights)]

    kernel = _make_vae_kernel(n_enc, n_dec, d_in, d_latent, d_in_p, d_latent_p,
                              compute_dtype)

    out_shape = (
        jax.ShapeDtypeStruct((B_pad, d_in_p), out_dtype),          # reconstruction (lane-padded)
        jax.ShapeDtypeStruct((B_pad, 2 * d_latent_p), out_dtype),  # mu | log_sigma fused
    )
    out_specs = (
        pl.BlockSpec((block_b, d_in_p), lambda i: (i, 0)),
        pl.BlockSpec((block_b, 2 * d_latent_p), lambda i: (i, 0)),
    )
    scratch_shapes = [
        pltpu.VMEM((block_b, d_in_p), compute_dtype),    # lane-padded x
        pltpu.VMEM((block_b, d_latent_p), jnp.float32),  # lane-padded eps
    ]

    recon_p, head_p = pl.pallas_call(
        kernel,
        grid=(B_pad // block_b,),
        in_specs=in_specs,
        out_specs=out_specs,
        out_shape=out_shape,
        scratch_shapes=scratch_shapes,
        compiler_params=pltpu.CompilerParams(
            dimension_semantics=("parallel",),   # batch axis; see CORE_PARALLEL TODO above
            vmem_limit_bytes=vmem_limit,
        ),
    )(*flat_inputs)

    # Lazy slices (fused by jit) strip batch/lane padding; consumers that can handle the
    # padded layout should use recon_p / head_p directly to skip this copy.
    recon = recon_p[:B, :d_in]
    mu = head_p[:B, :d_latent]
    log_sigma = head_p[:B, d_latent_p:d_latent_p + d_latent]
    return recon, mu, log_sigma


# ----------------------------------------------------------------------------
# Pure-JAX reference (for sanity checking); matmul_dtype mirrors the kernel's
# bf16 MXU inputs exactly.
# ----------------------------------------------------------------------------
def vae_forward_ref(x, noise, params, matmul_dtype=jnp.float32):
    def lin(h, w, b):
        return jnp.dot(h.astype(matmul_dtype), w.astype(matmul_dtype),
                       preferred_element_type=jnp.float32) + b

    h = x
    enc = params["encoder"]
    for i, (w, b) in enumerate(enc):
        h = lin(h, w, b)
        if i < len(enc) - 1:
            h = jnp.maximum(h, 0.0)
    mu = lin(h, *params["mu"])
    log_sigma = lin(h, *params["log_sigma"])
    z = mu + jnp.exp(log_sigma) * noise
    h = z
    dec = params["decoder"]
    for i, (w, b) in enumerate(dec):
        h = lin(h, w, b)
        if i < len(dec) - 1:
            h = jnp.maximum(h, 0.0)
    return h, mu, log_sigma


if __name__ == "__main__":
    # Small config consistent with the module's forward.
    num_encoder_layers = 2
    num_decoder_layers = 2
    batch = 8
    num_features = 32
    hidden_dim = 64
    latent_dim = 16

    key = jax.random.PRNGKey(0)
    k_param, k_x, k_noise = jax.random.split(key, 3)

    params = init_vae_params(k_param, num_encoder_layers, num_decoder_layers,
                             num_features, hidden_dim, latent_dim)
    x = jax.random.normal(k_x, (batch, num_features), jnp.float32)
    # torch.randn_like(log_sigma) equivalent: standard-normal noise fed in explicitly.
    noise = jax.random.normal(k_noise, (batch, latent_dim), jnp.float32)

    prepared = prepare_vae_params(params, matmul_dtype=jnp.bfloat16)

    try:
        outs = vae_forward(x, noise, prepared)
        jax.block_until_ready(outs)
    except Exception:
        # Fallback if the single-buffered weight hint (pl.Buffered(1)) is not supported
        # by the installed jax / Mosaic build.
        outs = vae_forward(x, noise, prepared, single_buffer_weights=False)
        jax.block_until_ready(outs)
    recon, mu, log_sigma = outs

    # Sanity check vs pure-JAX reference with matching (bf16) matmul precision.
    r_ref, mu_ref, ls_ref = vae_forward_ref(x, noise, params, matmul_dtype=jnp.bfloat16)
    assert recon.shape == (batch, num_features)
    assert mu.shape == (batch, latent_dim)
    assert log_sigma.shape == (batch, latent_dim)
    assert jnp.allclose(recon.astype(jnp.float32), r_ref, atol=2e-2, rtol=2e-2)
    assert jnp.allclose(mu.astype(jnp.float32), mu_ref, atol=2e-2, rtol=2e-2)
    assert jnp.allclose(log_sigma.astype(jnp.float32), ls_ref, atol=2e-2, rtol=2e-2)

    print("KERNEL_OK")
</pallas_src>

<mosaic_0001>
module attributes {stable_mosaic.version = 11 : i64} {
  func.func @kernel(%arg0: i32, %arg1: memref<8x32xf32, #tpu.memory_space<vmem>>, %arg2: memref<8x16xf32, #tpu.memory_space<vmem>>, %arg3: memref<128x128xbf16, #tpu.memory_space<vmem>>, %arg4: memref<1x128xf32, #tpu.memory_space<vmem>>, %arg5: memref<128x128xbf16, #tpu.memory_space<vmem>>, %arg6: memref<1x128xf32, #tpu.memory_space<vmem>>, %arg7: memref<128x256xbf16, #tpu.memory_space<vmem>>, %arg8: memref<1x256xf32, #tpu.memory_space<vmem>>, %arg9: memref<128x128xbf16, #tpu.memory_space<vmem>>, %arg10: memref<1x128xf32, #tpu.memory_space<vmem>>, %arg11: memref<128x128xbf16, #tpu.memory_space<vmem>>, %arg12: memref<1x128xf32, #tpu.memory_space<vmem>>, %arg13: memref<8x128xbf16, #tpu.memory_space<vmem>>, %arg14: memref<8x256xbf16, #tpu.memory_space<vmem>>, %arg15: memref<8x128xbf16, #tpu.memory_space<vmem>>, %arg16: memref<8x128xf32, #tpu.memory_space<vmem>>) attributes {dimension_semantics = [#tpu.dimension_semantics<parallel>], iteration_bounds = array<i64: 1>, scalar_prefetch = 0 : i64, scratch_operands = 2 : i64, tpu.core_type = #tpu.core_type<tc>, window_params = [{transform_indices = @transform_0, window_bounds = array<i64: 8, 32>}, {transform_indices = @transform_1, window_bounds = array<i64: 8, 16>}, {pipeline_mode = #tpu.pipeline_mode<synchronous>, transform_indices = @transform_2, window_bounds = array<i64: 128, 128>}, {pipeline_mode = #tpu.pipeline_mode<synchronous>, transform_indices = @transform_3, window_bounds = array<i64: 1, 128>}, {pipeline_mode = #tpu.pipeline_mode<synchronous>, transform_indices = @transform_4, window_bounds = array<i64: 128, 128>}, {pipeline_mode = #tpu.pipeline_mode<synchronous>, transform_indices = @transform_5, window_bounds = array<i64: 1, 128>}, {pipeline_mode = #tpu.pipeline_mode<synchronous>, transform_indices = @transform_6, window_bounds = array<i64: 128, 256>}, {pipeline_mode = #tpu.pipeline_mode<synchronous>, transform_indices = @transform_7, window_bounds = array<i64: 1, 256>}, {pipeline_mode = #tpu.pipeline_mode<synchronous>, transform_indices = @transform_8, window_bounds = array<i64: 128, 128>}, {pipeline_mode = #tpu.pipeline_mode<synchronous>, transform_indices = @transform_9, window_bounds = array<i64: 1, 128>}, {pipeline_mode = #tpu.pipeline_mode<synchronous>, transform_indices = @transform_10, window_bounds = array<i64: 128, 128>}, {pipeline_mode = #tpu.pipeline_mode<synchronous>, transform_indices = @transform_11, window_bounds = array<i64: 1, 128>}, {transform_indices = @transform_12, window_bounds = array<i64: 8, 128>}, {transform_indices = @transform_13, window_bounds = array<i64: 8, 256>}]} {
    %cst = arith.constant 0.000000e+00 : bf16
    %0 = vector.broadcast %cst : bf16 to vector<8x128xbf16>
    %c0 = arith.constant 0 : index
    %c0_0 = arith.constant 0 : index
    %1 = vector.load %arg15[%c0, %c0_0] : memref<8x128xbf16, #tpu.memory_space<vmem>>, vector<8x128xbf16>
    tpu.vector_store %arg15[%c0, %c0_0], %0 {strides = array<i32>} : memref<8x128xbf16, #tpu.memory_space<vmem>>, vector<8x128xbf16>,
    %c0_1 = arith.constant 0 : index
    %c0_2 = arith.constant 0 : index
    %2 = vector.load %arg1[%c0_1, %c0_2] : memref<8x32xf32, #tpu.memory_space<vmem>>, vector<8x32xf32>
    %3 = arith.truncf %2 : vector<8x32xf32> to vector<8x32xbf16>
    %c0_3 = arith.constant 0 : index
    %c0_4 = arith.constant 0 : index
    %4 = vector.load %arg15[%c0_3, %c0_4] : memref<8x128xbf16, #tpu.memory_space<vmem>>, vector<8x32xbf16>
    tpu.vector_store %arg15[%c0_3, %c0_4], %3 {strides = array<i32>} : memref<8x128xbf16, #tpu.memory_space<vmem>>, vector<8x32xbf16>,
    %c0_5 = arith.constant 0 : index
    %c0_6 = arith.constant 0 : index
    %5 = vector.load %arg15[%c0_5, %c0_6] : memref<8x128xbf16, #tpu.memory_space<vmem>>, vector<8x128xbf16>
    %c0_7 = arith.constant 0 : index
    %c0_8 = arith.constant 0 : index
    %6 = vector.load %arg3[%c0_7, %c0_8] : memref<128x128xbf16, #tpu.memory_space<vmem>>, vector<128x128xbf16>
    %cst_9 = arith.constant dense<0.000000e+00> : vector<8x128xf32>
    %7 = tpu.matmul %5, %6, %cst_9 {dimension_numbers = #tpu.dot_dimension_numbers<[1], [0], [0], [1], [0, 0, 1, 1], [], []>} : vector<8x128xbf16>, vector<128x128xbf16>, vector<8x128xf32> -> vector<8x128xf32>
    %c0_10 = arith.constant 0 : index
    %c0_11 = arith.constant 0 : index
    %8 = vector.load %arg4[%c0_10, %c0_11] : memref<1x128xf32, #tpu.memory_space<vmem>>, vector<1x128xf32>
    %9 = vector.broadcast %8 : vector<1x128xf32> to vector<8x128xf32>
    %10 = arith.addf %7, %9 : vector<8x128xf32>
    %cst_12 = arith.constant 0.000000e+00 : f32
    %11 = vector.broadcast %cst_12 : f32 to vector<8x128xf32>
    %12 = arith.maximumf %10, %11 : vector<8x128xf32>
    %13 = arith.truncf %12 : vector<8x128xf32> to vector<8x128xbf16>
    %c0_13 = arith.constant 0 : index
    %c0_14 = arith.constant 0 : index
    %14 = vector.load %arg5[%c0_13, %c0_14] : memref<128x128xbf16, #tpu.memory_space<vmem>>, vector<128x128xbf16>
    %cst_15 = arith.constant dense<0.000000e+00> : vector<8x128xf32>
    %15 = tpu.matmul %13, %14, %cst_15 {dimension_numbers = #tpu.dot_dimension_numbers<[1], [0], [0], [1], [0, 0, 1, 1], [], []>} : vector<8x128xbf16>, vector<128x128xbf16>, vector<8x128xf32> -> vector<8x128xf32>
    %c0_16 = arith.constant 0 : index
    %c0_17 = arith.constant 0 : index
    %16 = vector.load %arg6[%c0_16, %c0_17] : memref<1x128xf32, #tpu.memory_space<vmem>>, vector<1x128xf32>
    %17 = vector.broadcast %16 : vector<1x128xf32> to vector<8x128xf32>
    %18 = arith.addf %15, %17 : vector<8x128xf32>
    %19 = arith.truncf %18 : vector<8x128xf32> to vector<8x128xbf16>
    %c0_18 = arith.constant 0 : index
    %c0_19 = arith.constant 0 : index
    %20 = vector.load %arg7[%c0_18, %c0_19] : memref<128x256xbf16, #tpu.memory_space<vmem>>, vector<128x256xbf16>
    %cst_20 = arith.constant dense<0.000000e+00> : vector<8x256xf32>
    %21 = tpu.matmul %19, %20, %cst_20 {dimension_numbers = #tpu.dot_dimension_numbers<[1], [0], [0], [1], [0, 0, 1, 1], [], []>} : vector<8x128xbf16>, vector<128x256xbf16>, vector<8x256xf32> -> vector<8x256xf32>
    %c0_21 = arith.constant 0 : index
    %c0_22 = arith.constant 0 : index
    %22 = vector.load %arg8[%c0_21, %c0_22] : memref<1x256xf32, #tpu.memory_space<vmem>>, vector<1x256xf32>
    %23 = vector.broadcast %22 : vector<1x256xf32> to vector<8x256xf32>
    %24 = arith.addf %21, %23 : vector<8x256xf32>
    %25 = vector.extract_strided_slice %24 {offsets = [0, 0], sizes = [8, 128], strides = [1, 1]} : vector<8x256xf32> to vector<8x128xf32>
    %26 = vector.extract_strided_slice %24 {offsets = [0, 128], sizes = [8, 128], strides = [1, 1]} : vector<8x256xf32> to vector<8x128xf32>
    %cst_23 = arith.constant 0.000000e+00 : f32
    %27 = vector.broadcast %cst_23 : f32 to vector<8x128xf32>
    %c0_24 = arith.constant 0 : index
    %c0_25 = arith.constant 0 : index
    %28 = vector.load %arg16[%c0_24, %c0_25] : memref<8x128xf32, #tpu.memory_space<vmem>>, vector<8x128xf32>
    tpu.vector_store %arg16[%c0_24, %c0_25], %27 {strides = array<i32>} : memref<8x128xf32, #tpu.memory_space<vmem>>, vector<8x128xf32>,
    %c0_26 = arith.constant 0 : index
    %c0_27 = arith.constant 0 : index
    %29 = vector.load %arg2[%c0_26, %c0_27] : memref<8x16xf32, #tpu.memory_space<vmem>>, vector<8x16xf32>
    %c0_28 = arith.constant 0 : index
    %c0_29 = arith.constant 0 : index
    %30 = vector.load %arg16[%c0_28, %c0_29] : memref<8x128xf32, #tpu.memory_space<vmem>>, vector<8x16xf32>
    tpu.vector_store %arg16[%c0_28, %c0_29], %29 {strides = array<i32>} : memref<8x128xf32, #tpu.memory_space<vmem>>, vector<8x16xf32>,
    %c0_30 = arith.constant 0 : index
    %c0_31 = arith.constant 0 : index
    %31 = vector.load %arg16[%c0_30, %c0_31] : memref<8x128xf32, #tpu.memory_space<vmem>>, vector<8x128xf32>
    %32 = math.exp %26 : vector<8x128xf32>
    %33 = arith.mulf %32, %31 : vector<8x128xf32>
    %34 = arith.addf %25, %33 : vector<8x128xf32>
    %35 = arith.truncf %34 : vector<8x128xf32> to vector<8x128xbf16>
    %c0_32 = arith.constant 0 : index
    %c0_33 = arith.constant 0 : index
    %36 = vector.load %arg9[%c0_32, %c0_33] : memref<128x128xbf16, #tpu.memory_space<vmem>>, vector<128x128xbf16>
    %cst_34 = arith.constant dense<0.000000e+00> : vector<8x128xf32>
    %37 = tpu.matmul %35, %36, %cst_34 {dimension_numbers = #tpu.dot_dimension_numbers<[1], [0], [0], [1], [0, 0, 1, 1], [], []>} : vector<8x128xbf16>, vector<128x128xbf16>, vector<8x128xf32> -> vector<8x128xf32>
    %c0_35 = arith.constant 0 : index
    %c0_36 = arith.constant 0 : index
    %38 = vector.load %arg10[%c0_35, %c0_36] : memref<1x128xf32, #tpu.memory_space<vmem>>, vector<1x128xf32>
    %39 = vector.broadcast %38 : vector<1x128xf32> to vector<8x128xf32>
    %40 = arith.addf %37, %39 : vector<8x128xf32>
    %cst_37 = arith.constant 0.000000e+00 : f32
    %41 = vector.broadcast %cst_37 : f32 to vector<8x128xf32>
    %42 = arith.maximumf %40, %41 : vector<8x128xf32>
    %43 = arith.truncf %42 : vector<8x128xf32> to vector<8x128xbf16>
    %c0_38 = arith.constant 0 : index
    %c0_39 = arith.constant 0 : index
    %44 = vector.load %arg11[%c0_38, %c0_39] : memref<128x128xbf16, #tpu.memory_space<vmem>>, vector<128x128xbf16>
    %cst_40 = arith.constant dense<0.000000e+00> : vector<8x128xf32>
    %45 = tpu.matmul %43, %44, %cst_40 {dimension_numbers = #tpu.dot_dimension_numbers<[1], [0], [0], [1], [0, 0, 1, 1], [], []>} : vector<8x128xbf16>, vector<128x128xbf16>, vector<8x128xf32> -> vector<8x128xf32>
    %c0_41 = arith.constant 0 : index
    %c0_42 = arith.constant 0 : index
    %46 = vector.load %arg12[%c0_41, %c0_42] : memref<1x128xf32, #tpu.memory_space<vmem>>, vector<1x128xf32>
    %47 = vector.broadcast %46 : vector<1x128xf32> to vector<8x128xf32>
    %48 = arith.addf %45, %47 : vector<8x128xf32>
    %49 = arith.truncf %48 : vector<8x128xf32> to vector<8x128xbf16>
    %c0_43 = arith.constant 0 : index
    %c0_44 = arith.constant 0 : index
    %50 = vector.load %arg13[%c0_43, %c0_44] : memref<8x128xbf16, #tpu.memory_space<vmem>>, vector<8x128xbf16>
    tpu.vector_store %arg13[%c0_43, %c0_44], %49 {strides = array<i32>} : memref<8x128xbf16, #tpu.memory_space<vmem>>, vector<8x128xbf16>,
    %51 = arith.truncf %24 : vector<8x256xf32> to vector<8x256xbf16>
    %c0_45 = arith.constant 0 : index
    %c0_46 = arith.constant 0 : index
    %52 = vector.load %arg14[%c0_45, %c0_46] : memref<8x256xbf16, #tpu.memory_space<vmem>>, vector<8x256xbf16>
    tpu.vector_store %arg14[%c0_45, %c0_46], %51 {strides = array<i32>} : memref<8x256xbf16, #tpu.memory_space<vmem>>, vector<8x256xbf16>,
    return
  }
  func.func @transform_0(%arg0: i32) -> (i32, i32) {
    %c0_i32 = arith.constant 0 : i32
    %c0_i32_0 = arith.constant 0 : i32
    return %arg0, %c0_i32 : i32, i32
  }
  func.func @transform_1(%arg0: i32) -> (i32, i32) {
    %c0_i32 = arith.constant 0 : i32
    %c0_i32_0 = arith.constant 0 : i32
    return %arg0, %c0_i32 : i32, i32
  }
  func.func @transform_2(%arg0: i32) -> (i32, i32) {
    %c0_i32 = arith.constant 0 : i32
    %c0_i32_0 = arith.constant 0 : i32
    %c0_i32_1 = arith.constant 0 : i32
    return %c0_i32, %c0_i32_0 : i32, i32
  }
  func.func @transform_3(%arg0: i32) -> (i32, i32) {
    %c0_i32 = arith.constant 0 : i32
    %c0_i32_0 = arith.constant 0 : i32
    %c0_i32_1 = arith.constant 0 : i32
    return %c0_i32, %c0_i32_0 : i32, i32
  }
  func.func @transform_4(%arg0: i32) -> (i32, i32) {
    %c0_i32 = arith.constant 0 : i32
    %c0_i32_0 = arith.constant 0 : i32
    %c0_i32_1 = arith.constant 0 : i32
    return %c0_i32, %c0_i32_0 : i32, i32
  }
  func.func @transform_5(%arg0: i32) -> (i32, i32) {
    %c0_i32 = arith.constant 0 : i32
    %c0_i32_0 = arith.constant 0 : i32
    %c0_i32_1 = arith.constant 0 : i32
    return %c0_i32, %c0_i32_0 : i32, i32
  }
  func.func @transform_6(%arg0: i32) -> (i32, i32) {
    %c0_i32 = arith.constant 0 : i32
    %c0_i32_0 = arith.constant 0 : i32
    %c0_i32_1 = arith.constant 0 : i32
    return %c0_i32, %c0_i32_0 : i32, i32
  }
  func.func @transform_7(%arg0: i32) -> (i32, i32) {
    %c0_i32 = arith.constant 0 : i32
    %c0_i32_0 = arith.constant 0 : i32
    %c0_i32_1 = arith.constant 0 : i32
    return %c0_i32, %c0_i32_0 : i32, i32
  }
  func.func @transform_8(%arg0: i32) -> (i32, i32) {
    %c0_i32 = arith.constant 0 : i32
    %c0_i32_0 = arith.constant 0 : i32
    %c0_i32_1 = arith.constant 0 : i32
    return %c0_i32, %c0_i32_0 : i32, i32
  }
  func.func @transform_9(%arg0: i32) -> (i32, i32) {
    %c0_i32 = arith.constant 0 : i32
    %c0_i32_0 = arith.constant 0 : i32
    %c0_i32_1 = arith.constant 0 : i32
    return %c0_i32, %c0_i32_0 : i32, i32
  }
  func.func @transform_10(%arg0: i32) -> (i32, i32) {
    %c0_i32 = arith.constant 0 : i32
    %c0_i32_0 = arith.constant 0 : i32
    %c0_i32_1 = arith.constant 0 : i32
    return %c0_i32, %c0_i32_0 : i32, i32
  }
  func.func @transform_11(%arg0: i32) -> (i32, i32) {
    %c0_i32 = arith.constant 0 : i32
    %c0_i32_0 = arith.constant 0 : i32
    %c0_i32_1 = arith.constant 0 : i32
    return %c0_i32, %c0_i32_0 : i32, i32
  }
  func.func @transform_12(%arg0: i32) -> (i32, i32) {
    %c0_i32 = arith.constant 0 : i32
    %c0_i32_0 = arith.constant 0 : i32
    return %arg0, %c0_i32 : i32, i32
  }
  func.func @transform_13(%arg0: i32) -> (i32, i32) {
    %c0_i32 = arith.constant 0 : i32
    %c0_i32_0 = arith.constant 0 : i32
    return %arg0, %c0_i32 : i32, i32
  }
}

module attributes {stable_mosaic.version = 11 : i64} {
  func.func @kernel(%arg0: i32, %arg1: memref<8x32xf32, #tpu.memory_space<vmem>>, %arg2: memref<8x16xf32, #tpu.memory_space<vmem>>, %arg3: memref<128x128xbf16, #tpu.memory_space<vmem>>, %arg4: memref<1x128xf32, #tpu.memory_space<vmem>>, %arg5: memref<128x128xbf16, #tpu.memory_space<vmem>>, %arg6: memref<1x128xf32, #tpu.memory_space<vmem>>, %arg7: memref<128x256xbf16, #tpu.memory_space<vmem>>, %arg8: memref<1x256xf32, #tpu.memory_space<vmem>>, %arg9: memref<128x128xbf16, #tpu.memory_space<vmem>>, %arg10: memref<1x128xf32, #tpu.memory_space<vmem>>, %arg11: memref<128x128xbf16, #tpu.memory_space<vmem>>, %arg12: memref<1x128xf32, #tpu.memory_space<vmem>>, %arg13: memref<8x128xbf16, #tpu.memory_space<vmem>>, %arg14: memref<8x256xbf16, #tpu.memory_space<vmem>>, %arg15: memref<8x128xbf16, #tpu.memory_space<vmem>>, %arg16: memref<8x128xf32, #tpu.memory_space<vmem>>) attributes {dimension_semantics = [#tpu.dimension_semantics<parallel>], iteration_bounds = array<i64: 1>, scalar_prefetch = 0 : i64, scratch_operands = 2 : i64, tpu.core_type = #tpu.core_type<tc>, window_params = [{transform_indices = @transform_0, window_bounds = array<i64: 8, 32>}, {transform_indices = @transform_1, window_bounds = array<i64: 8, 16>}, {pipeline_mode = #tpu.pipeline_mode<synchronous>, transform_indices = @transform_2, window_bounds = array<i64: 128, 128>}, {pipeline_mode = #tpu.pipeline_mode<synchronous>, transform_indices = @transform_3, window_bounds = array<i64: 1, 128>}, {pipeline_mode = #tpu.pipeline_mode<synchronous>, transform_indices = @transform_4, window_bounds = array<i64: 128, 128>}, {pipeline_mode = #tpu.pipeline_mode<synchronous>, transform_indices = @transform_5, window_bounds = array<i64: 1, 128>}, {pipeline_mode = #tpu.pipeline_mode<synchronous>, transform_indices = @transform_6, window_bounds = array<i64: 128, 256>}, {pipeline_mode = #tpu.pipeline_mode<synchronous>, transform_indices = @transform_7, window_bounds = array<i64: 1, 256>}, {pipeline_mode = #tpu.pipeline_mode<synchronous>, transform_indices = @transform_8, window_bounds = array<i64: 128, 128>}, {pipeline_mode = #tpu.pipeline_mode<synchronous>, transform_indices = @transform_9, window_bounds = array<i64: 1, 128>}, {pipeline_mode = #tpu.pipeline_mode<synchronous>, transform_indices = @transform_10, window_bounds = array<i64: 128, 128>}, {pipeline_mode = #tpu.pipeline_mode<synchronous>, transform_indices = @transform_11, window_bounds = array<i64: 1, 128>}, {transform_indices = @transform_12, window_bounds = array<i64: 8, 128>}, {transform_indices = @transform_13, window_bounds = array<i64: 8, 256>}]} {
    %cst = arith.constant 0.000000e+00 : bf16
    %0 = vector.broadcast %cst : bf16 to vector<8x128xbf16>
    %c0 = arith.constant 0 : index
    %c0_0 = arith.constant 0 : index
    %1 = vector.load %arg15[%c0, %c0_0] : memref<8x128xbf16, #tpu.memory_space<vmem>>, vector<8x128xbf16>
    tpu.vector_store %arg15[%c0, %c0_0], %0 {strides = array<i32>} : memref<8x128xbf16, #tpu.memory_space<vmem>>, vector<8x128xbf16>,
    %c0_1 = arith.constant 0 : index
    %c0_2 = arith.constant 0 : index
    %2 = vector.load %arg1[%c0_1, %c0_2] : memref<8x32xf32, #tpu.memory_space<vmem>>, vector<8x32xf32>
    %3 = arith.truncf %2 : vector<8x32xf32> to vector<8x32xbf16>
    %c0_3 = arith.constant 0 : index
    %c0_4 = arith.constant 0 : index
    %4 = vector.load %arg15[%c0_3, %c0_4] : memref<8x128xbf16, #tpu.memory_space<vmem>>, vector<8x32xbf16>
    tpu.vector_store %arg15[%c0_3, %c0_4], %3 {strides = array<i32>} : memref<8x128xbf16, #tpu.memory_space<vmem>>, vector<8x32xbf16>,
    %c0_5 = arith.constant 0 : index
    %c0_6 = arith.constant 0 : index
    %5 = vector.load %arg15[%c0_5, %c0_6] : memref<8x128xbf16, #tpu.memory_space<vmem>>, vector<8x128xbf16>
    %c0_7 = arith.constant 0 : index
    %c0_8 = arith.constant 0 : index
    %6 = vector.load %arg3[%c0_7, %c0_8] : memref<128x128xbf16, #tpu.memory_space<vmem>>, vector<128x128xbf16>
    %cst_9 = arith.constant dense<0.000000e+00> : vector<8x128xf32>
    %7 = tpu.matmul %5, %6, %cst_9 {dimension_numbers = #tpu.dot_dimension_numbers<[1], [0], [0], [1], [0, 0, 1, 1], [], []>} : vector<8x128xbf16>, vector<128x128xbf16>, vector<8x128xf32> -> vector<8x128xf32>
    %c0_10 = arith.constant 0 : index
    %c0_11 = arith.constant 0 : index
    %8 = vector.load %arg4[%c0_10, %c0_11] : memref<1x128xf32, #tpu.memory_space<vmem>>, vector<1x128xf32>
    %9 = vector.broadcast %8 : vector<1x128xf32> to vector<8x128xf32>
    %10 = arith.addf %7, %9 : vector<8x128xf32>
    %cst_12 = arith.constant 0.000000e+00 : f32
    %11 = vector.broadcast %cst_12 : f32 to vector<8x128xf32>
    %12 = arith.maximumf %10, %11 : vector<8x128xf32>
    %13 = arith.truncf %12 : vector<8x128xf32> to vector<8x128xbf16>
    %c0_13 = arith.constant 0 : index
    %c0_14 = arith.constant 0 : index
    %14 = vector.load %arg5[%c0_13, %c0_14] : memref<128x128xbf16, #tpu.memory_space<vmem>>, vector<128x128xbf16>
    %cst_15 = arith.constant dense<0.000000e+00> : vector<8x128xf32>
    %15 = tpu.matmul %13, %14, %cst_15 {dimension_numbers = #tpu.dot_dimension_numbers<[1], [0], [0], [1], [0, 0, 1, 1], [], []>} : vector<8x128xbf16>, vector<128x128xbf16>, vector<8x128xf32> -> vector<8x128xf32>
    %c0_16 = arith.constant 0 : index
    %c0_17 = arith.constant 0 : index
    %16 = vector.load %arg6[%c0_16, %c0_17] : memref<1x128xf32, #tpu.memory_space<vmem>>, vector<1x128xf32>
    %17 = vector.broadcast %16 : vector<1x128xf32> to vector<8x128xf32>
    %18 = arith.addf %15, %17 : vector<8x128xf32>
    %19 = arith.truncf %18 : vector<8x128xf32> to vector<8x128xbf16>
    %c0_18 = arith.constant 0 : index
    %c0_19 = arith.constant 0 : index
    %20 = vector.load %arg7[%c0_18, %c0_19] : memref<128x256xbf16, #tpu.memory_space<vmem>>, vector<128x256xbf16>
    %cst_20 = arith.constant dense<0.000000e+00> : vector<8x256xf32>
    %21 = tpu.matmul %19, %20, %cst_20 {dimension_numbers = #tpu.dot_dimension_numbers<[1], [0], [0], [1], [0, 0, 1, 1], [], []>} : vector<8x128xbf16>, vector<128x256xbf16>, vector<8x256xf32> -> vector<8x256xf32>
    %c0_21 = arith.constant 0 : index
    %c0_22 = arith.constant 0 : index
    %22 = vector.load %arg8[%c0_21, %c0_22] : memref<1x256xf32, #tpu.memory_space<vmem>>, vector<1x256xf32>
    %23 = vector.broadcast %22 : vector<1x256xf32> to vector<8x256xf32>
    %24 = arith.addf %21, %23 : vector<8x256xf32>
    %25 = vector.extract_strided_slice %24 {offsets = [0, 0], sizes = [8, 128], strides = [1, 1]} : vector<8x256xf32> to vector<8x128xf32>
    %26 = vector.extract_strided_slice %24 {offsets = [0, 128], sizes = [8, 128], strides = [1, 1]} : vector<8x256xf32> to vector<8x128xf32>
    %cst_23 = arith.constant 0.000000e+00 : f32
    %27 = vector.broadcast %cst_23 : f32 to vector<8x128xf32>
    %c0_24 = arith.constant 0 : index
    %c0_25 = arith.constant 0 : index
    %28 = vector.load %arg16[%c0_24, %c0_25] : memref<8x128xf32, #tpu.memory_space<vmem>>, vector<8x128xf32>
    tpu.vector_store %arg16[%c0_24, %c0_25], %27 {strides = array<i32>} : memref<8x128xf32, #tpu.memory_space<vmem>>, vector<8x128xf32>,
    %c0_26 = arith.constant 0 : index
    %c0_27 = arith.constant 0 : index
    %29 = vector.load %arg2[%c0_26, %c0_27] : memref<8x16xf32, #tpu.memory_space<vmem>>, vector<8x16xf32>
    %c0_28 = arith.constant 0 : index
    %c0_29 = arith.constant 0 : index
    %30 = vector.load %arg16[%c0_28, %c0_29] : memref<8x128xf32, #tpu.memory_space<vmem>>, vector<8x16xf32>
    tpu.vector_store %arg16[%c0_28, %c0_29], %29 {strides = array<i32>} : memref<8x128xf32, #tpu.memory_space<vmem>>, vector<8x16xf32>,
    %c0_30 = arith.constant 0 : index
    %c0_31 = arith.constant 0 : index
    %31 = vector.load %arg16[%c0_30, %c0_31] : memref<8x128xf32, #tpu.memory_space<vmem>>, vector<8x128xf32>
    %32 = math.exp %26 : vector<8x128xf32>
    %33 = arith.mulf %32, %31 : vector<8x128xf32>
    %34 = arith.addf %25, %33 : vector<8x128xf32>
    %35 = arith.truncf %34 : vector<8x128xf32> to vector<8x128xbf16>
    %c0_32 = arith.constant 0 : index
    %c0_33 = arith.constant 0 : index
    %36 = vector.load %arg9[%c0_32, %c0_33] : memref<128x128xbf16, #tpu.memory_space<vmem>>, vector<128x128xbf16>
    %cst_34 = arith.constant dense<0.000000e+00> : vector<8x128xf32>
    %37 = tpu.matmul %35, %36, %cst_34 {dimension_numbers = #tpu.dot_dimension_numbers<[1], [0], [0], [1], [0, 0, 1, 1], [], []>} : vector<8x128xbf16>, vector<128x128xbf16>, vector<8x128xf32> -> vector<8x128xf32>
    %c0_35 = arith.constant 0 : index
    %c0_36 = arith.constant 0 : index
    %38 = vector.load %arg10[%c0_35, %c0_36] : memref<1x128xf32, #tpu.memory_space<vmem>>, vector<1x128xf32>
    %39 = vector.broadcast %38 : vector<1x128xf32> to vector<8x128xf32>
    %40 = arith.addf %37, %39 : vector<8x128xf32>
    %cst_37 = arith.constant 0.000000e+00 : f32
    %41 = vector.broadcast %cst_37 : f32 to vector<8x128xf32>
    %42 = arith.maximumf %40, %41 : vector<8x128xf32>
    %43 = arith.truncf %42 : vector<8x128xf32> to vector<8x128xbf16>
    %c0_38 = arith.constant 0 : index
    %c0_39 = arith.constant 0 : index
    %44 = vector.load %arg11[%c0_38, %c0_39] : memref<128x128xbf16, #tpu.memory_space<vmem>>, vector<128x128xbf16>
    %cst_40 = arith.constant dense<0.000000e+00> : vector<8x128xf32>
    %45 = tpu.matmul %43, %44, %cst_40 {dimension_numbers = #tpu.dot_dimension_numbers<[1], [0], [0], [1], [0, 0, 1, 1], [], []>} : vector<8x128xbf16>, vector<128x128xbf16>, vector<8x128xf32> -> vector<8x128xf32>
    %c0_41 = arith.constant 0 : index
    %c0_42 = arith.constant 0 : index
    %46 = vector.load %arg12[%c0_41, %c0_42] : memref<1x128xf32, #tpu.memory_space<vmem>>, vector<1x128xf32>
    %47 = vector.broadcast %46 : vector<1x128xf32> to vector<8x128xf32>
    %48 = arith.addf %45, %47 : vector<8x128xf32>
    %49 = arith.truncf %48 : vector<8x128xf32> to vector<8x128xbf16>
    %c0_43 = arith.constant 0 : index
    %c0_44 = arith.constant 0 : index
    %50 = vector.load %arg13[%c0_43, %c0_44] : memref<8x128xbf16, #tpu.memory_space<vmem>>, vector<8x128xbf16>
    tpu.vector_store %arg13[%c0_43, %c0_44], %49 {strides = array<i32>} : memref<8x128xbf16, #tpu.memory_space<vmem>>, vector<8x128xbf16>,
    %51 = arith.truncf %24 : vector<8x256xf32> to vector<8x256xbf16>
    %c0_45 = arith.constant 0 : index
    %c0_46 = arith.constant 0 : index
    %52 = vector.load %arg14[%c0_45, %c0_46] : memref<8x256xbf16, #tpu.memory_space<vmem>>, vector<8x256xbf16>
    tpu.vector_store %arg14[%c0_45, %c0_46], %51 {strides = array<i32>} : memref<8x256xbf16, #tpu.memory_space<vmem>>, vector<8x256xbf16>,
    return
  }
  func.func @transform_0(%arg0: i32) -> (i32, i32) {
    %c0_i32 = arith.constant 0 : i32
    %c0_i32_0 = arith.constant 0 : i32
    return %arg0, %c0_i32 : i32, i32
  }
  func.func @transform_1(%arg0: i32) -> (i32, i32) {
    %c0_i32 = arith.constant 0 : i32
    %c0_i32_0 = arith.constant 0 : i32
    return %arg0, %c0_i32 : i32, i32
  }
  func.func @transform_2(%arg0: i32) -> (i32, i32) {
    %c0_i32 = arith.constant 0 : i32
    %c0_i32_0 = arith.constant 0 : i32
    %c0_i32_1 = arith.constant 0 : i32
    return %c0_i32, %c0_i32_0 : i32, i32
  }
  func.func @transform_3(%arg0: i32) -> (i32, i32) {
    %c0_i32 = arith.constant 0 : i32
    %c0_i32_0 = arith.constant 0 : i32
    %c0_i32_1 = arith.constant 0 : i32
    return %c0_i32, %c0_i32_0 : i32, i32
  }
  func.func @transform_4(%arg0: i32) -> (i32, i32) {
    %c0_i32 = arith.constant 0 : i32
    %c0_i32_0 = arith.constant 0 : i32
    %c0_i32_1 = arith.constant 0 : i32
    return %c0_i32, %c0_i32_0 : i32, i32
  }
  func.func @transform_5(%arg0: i32) -> (i32, i32) {
    %c0_i32 = arith.constant 0 : i32
    %c0_i32_0 = arith.constant 0 : i32
    %c0_i32_1 = arith.constant 0 : i32
    return %c0_i32, %c0_i32_0 : i32, i32
  }
  func.func @transform_6(%arg0: i32) -> (i32, i32) {
    %c0_i32 = arith.constant 0 : i32
    %c0_i32_0 = arith.constant 0 : i32
    %c0_i32_1 = arith.constant 0 : i32
    return %c0_i32, %c0_i32_0 : i32, i32
  }
  func.func @transform_7(%arg0: i32) -> (i32, i32) {
    %c0_i32 = arith.constant 0 : i32
    %c0_i32_0 = arith.constant 0 : i32
    %c0_i32_1 = arith.constant 0 : i32
    return %c0_i32, %c0_i32_0 : i32, i32
  }
  func.func @transform_8(%arg0: i32) -> (i32, i32) {
    %c0_i32 = arith.constant 0 : i32
    %c0_i32_0 = arith.constant 0 : i32
    %c0_i32_1 = arith.constant 0 : i32
    return %c0_i32, %c0_i32_0 : i32, i32
  }
  func.func @transform_9(%arg0: i32) -> (i32, i32) {
    %c0_i32 = arith.constant 0 : i32
    %c0_i32_0 = arith.constant 0 : i32
    %c0_i32_1 = arith.constant 0 : i32
    return %c0_i32, %c0_i32_0 : i32, i32
  }
  func.func @transform_10(%arg0: i32) -> (i32, i32) {
    %c0_i32 = arith.constant 0 : i32
    %c0_i32_0 = arith.constant 0 : i32
    %c0_i32_1 = arith.constant 0 : i32
    return %c0_i32, %c0_i32_0 : i32, i32
  }
  func.func @transform_11(%arg0: i32) -> (i32, i32) {
    %c0_i32 = arith.constant 0 : i32
    %c0_i32_0 = arith.constant 0 : i32
    %c0_i32_1 = arith.constant 0 : i32
    return %c0_i32, %c0_i32_0 : i32, i32
  }
  func.func @transform_12(%arg0: i32) -> (i32, i32) {
    %c0_i32 = arith.constant 0 : i32
    %c0_i32_0 = arith.constant 0 : i32
    return %arg0, %c0_i32 : i32, i32
  }
  func.func @transform_13(%arg0: i32) -> (i32, i32) {
    %c0_i32 = arith.constant 0 : i32
    %c0_i32_0 = arith.constant 0 : i32
    return %arg0, %c0_i32 : i32, i32
  }
}

</mosaic_0001>

<bundles_post_ra>
// kernel: vae_forward.1
= control target key start
LH: loop header
LB: loop body
LE: loop exit
PB: predicated region body
PF: predicated region fallthrough
CT: control target
= control target key end

     0   :  { %19 = vsyncpa [#allocation5], 0  ;;  %s1376_s0 = inlined_call_operand.hbm [shape: f32[8,32], index: 0, kind: input, shape index: {}]   ;;  %s1377_s1 = inlined_call_operand.hbm [shape: f32[8,16], index: 1, kind: input, shape index: {}]   ;;  %s1378_s2 = inlined_call_operand.hbm [shape: bf16[128,128], index: 2, kind: input, shape index: {}]   ;;  %s1379_s3 = inlined_call_operand.vmem [shape: f32[1,128], index: 3, kind: input, shape index: {}]   ;;  %s1380_s4 = inlined_call_operand.hbm [shape: bf16[128,128], index: 4, kind: input, shape index: {}]   ;;  %s1381_s5 = inlined_call_operand.vmem [shape: f32[1,128], index: 5, kind: input, shape index: {}]   ;;  %s1382_s6 = inlined_call_operand.hbm [shape: bf16[128,256], index: 6, kind: input, shape index: {}]   ;;  %s1383_s7 = inlined_call_operand.vmem [shape: f32[1,256], index: 7, kind: input, shape index: {}]   ;;  %s1384_s8 = inlined_call_operand.hbm [shape: bf16[128,128], index: 8, kind: input, shape index: {}]   ;;  %s1385_s9 = inlined_call_operand.vmem [shape: f32[1,128], index: 9, kind: input, shape index: {}]   ;;  %s1386_s10 = inlined_call_operand.hbm [shape: bf16[128,128], index: 10, kind: input, shape index: {}]   ;;  %s1387_s11 = inlined_call_operand.vmem [shape: f32[1,128], index: 11, kind: input, shape index: {}]   ;;  %s1388_s12 = inlined_call_operand.hbm [shape: bf16[8,128], index: 12, kind: output, shape index: {0}]   ;;  %s1389_s13 = inlined_call_operand.vmem [shape: bf16[8,256], index: 13, kind: output, shape index: {1}]  }
   0x1   :  { %20 = vsyncpa [#allocation8], 0 }
   0x2   :  { %21 = vsyncpa [#allocation11], 0 }
   0x3   :  { %22 = vsyncpa [#allocation14], 0 }
   0x4   :  { %23 = vsyncpa [#allocation6], 0  ;;  %s1196_s25 = smov [#allocation7]  }
   0x5   :  { %s40_s26 = sshll.u32 %s1196_s25, 4  ;;  %s41_s26 = int_to_ptr.vmem [resolvable:$true] %s40_s26 }
   0x6   :  { %s1034_s27 = scalar_lea.vmem %s41_s26, 128  ;;  %p1039_p1 = scmp.lt.s32.totalorder %s41_s26, %s41_s26 }
   0x7   :  { %p1035_p0 = scmp.ne.s32.totalorder %s41_s26, %s1034_s27  ;;  %p1040_p2 = scmp.lt.s32.totalorder %s1034_s27, %s1034_s27 }
   0x9   :  { %p1041_p3 = por %p1040_p2, %p1039_p1 }
   0xb   :  { %p1042_p4 = pnand %p1041_p3, %p1035_p0 }
   0xd   :  { %1045 = shalt.err (!%p1042_p4)
}
   0xe   :  { %43 = dma.hbm_to_vmem [thread:$0]  %s1377_s1, 128, %s41_s26, [#allocation8]  }
   0xf   :  { %s1197_s30 = smov [#allocation10]   ;;  %s1198_s15 = smov [#allocation13]  }
  0x10   :  { %s63_s14 = sshll.u32 %s1197_s30, 4  ;;  %s91_s16 = sshll.u32 %s1198_s15, 4  ;;  %s64_s14 = int_to_ptr.vmem [resolvable:$true] %s63_s14  ;;  %s92_s16 = int_to_ptr.vmem [resolvable:$true] %s91_s16 }
  0x11   :  { %s1054_s17 = scalar_lea.vmem %s64_s14, 1024  ;;  %p1059_p6 = scmp.lt.s32.totalorder %s64_s14, %s64_s14 }
  0x12   :  { %p1055_p5 = scmp.ne.s32.totalorder %s64_s14, %s1054_s17  ;;  %p1060_p7 = scmp.lt.s32.totalorder %s1054_s17, %s1054_s17 }
  0x14   :  { %p1061_p8 = por %p1060_p7, %p1059_p6 }
  0x16   :  { %p1062_p9 = pnand %p1061_p8, %p1055_p5 }
  0x18   :  { %1065 = shalt.err (!%p1062_p9)
}
  0x19   :  { %s1199_s18 = smov 64   ;;  %s1200_s19 = smov 4  }
  0x1a   :  { %69 = dma.hbm_to_vmem [thread:$0]  %s1380_s4, 1024, %s64_s14, [#allocation11], %s1199_s18, %s1199_s18, %s1200_s19  }
  0x1b   :  { %s1074_s1 = scalar_lea.vmem %s92_s16, 1024  ;;  %p1079_p11 = scmp.lt.s32.totalorder %s92_s16, %s92_s16 }
  0x1c   :  { %p1075_p10 = scmp.ne.s32.totalorder %s92_s16, %s1074_s1  ;;  %p1080_p12 = scmp.lt.s32.totalorder %s1074_s1, %s1074_s1 }
  0x1e   :  { %p1081_p13 = por %p1080_p12, %p1079_p11 }
  0x20   :  { %p1082_p0 = pnand %p1081_p13, %p1075_p10 }
  0x22   :  { %1085 = shalt.err (!%p1082_p0)
}
  0x23   :  { %97 = dma.hbm_to_vmem [thread:$0]  %s1384_s8, 1024, %s92_s16, [#allocation14], %s1199_s18, %s1199_s18, %s1200_s19  }
  0x24   :  { %s1201_s24 = smov [#allocation4]   ;;  %s1202_s26 = smov [#allocation9]  }
  0x25   :  { %s30_s25 = sshll.u32 %s1201_s24, 4  ;;  %s49_s4 = sshll.u32 %s1202_s26, 4  ;;  %s31_s25 = int_to_ptr.vmem [resolvable:$true] %s30_s25  ;;  %s50_s4 = int_to_ptr.vmem [resolvable:$true] %s49_s4 }
  0x26   :  { %s1094_s27 = scalar_lea.vmem %s31_s25, 128  ;;  %p1099_p2 = scmp.lt.s32.totalorder %s31_s25, %s31_s25 }
  0x27   :  { %p1095_p1 = scmp.ne.s32.totalorder %s31_s25, %s1094_s27  ;;  %p1100_p3 = scmp.lt.s32.totalorder %s1094_s27, %s1094_s27 }
  0x29   :  { %p1101_p4 = por %p1100_p3, %p1099_p2 }
  0x2b   :  { %p1102_p5 = pnand %p1101_p4, %p1095_p1 }
  0x2d   :  { %1105 = shalt.err (!%p1102_p5)
}
  0x2e   :  { %33 = dma.hbm_to_vmem [thread:$0]  %s1376_s0, 128, %s31_s25, [#allocation5]  }
  0x2f   :  { %s1114_s30 = scalar_lea.vmem %s50_s4, 1024  ;;  %p1119_p7 = scmp.lt.s32.totalorder %s50_s4, %s50_s4 }
  0x30   :  { %p1115_p6 = scmp.ne.s32.totalorder %s50_s4, %s1114_s30  ;;  %p1120_p8 = scmp.lt.s32.totalorder %s1114_s30, %s1114_s30 }
  0x32   :  { %p1121_p9 = por %p1120_p8, %p1119_p7 }
  0x34   :  { %p1122_p10 = pnand %p1121_p9, %p1115_p6 }
  0x36   :  { %1125 = shalt.err (!%p1122_p10)
}
  0x37   :  { %55 = dma.hbm_to_vmem [thread:$0]  %s1378_s2, 1024, %s50_s4, [#allocation8], %s1199_s18, %s1199_s18, %s1200_s19  }
  0x38   :  { %s1203_s15 = smov [#allocation12]  }
  0x39   :  { %s77_s16 = sshll.u32 %s1203_s15, 4  ;;  %s78_s16 = int_to_ptr.vmem [resolvable:$true] %s77_s16 }
  0x3a   :  { %s1134_s17 = scalar_lea.vmem %s78_s16, 2048  ;;  %p1139_p12 = scmp.lt.s32.totalorder %s78_s16, %s78_s16 }
  0x3b   :  { %p1135_p11 = scmp.ne.s32.totalorder %s78_s16, %s1134_s17  ;;  %p1140_p13 = scmp.lt.s32.totalorder %s1134_s17, %s1134_s17 }
  0x3d   :  { %p1141_p0 = por %p1140_p13, %p1139_p12 }
  0x3f   :  { %p1142_p1 = pnand %p1141_p0, %p1135_p11 }
  0x41   :  { %1145 = shalt.err (!%p1142_p1)
}
  0x42   :  { %s1204_s0 = smov 128   ;;  %s1205_s20 = smov 8  }
  0x43   :  { %83 = dma.hbm_to_vmem [thread:$0]  %s1382_s6, 2048, %s78_s16, [#allocation11], %s1204_s0, %s1204_s0, %s1205_s20  }
  0x44   :  { %s1206_s22 = smov [#allocation15]  }
  0x45   :  { %s105_s23 = sshll.u32 %s1206_s22, 4  ;;  %s106_s23 = int_to_ptr.vmem [resolvable:$true] %s105_s23 }
  0x46   :  { %s1154_s2 = scalar_lea.vmem %s106_s23, 1024  ;;  %p1159_p3 = scmp.lt.s32.totalorder %s106_s23, %s106_s23 }
  0x47   :  { %p1155_p2 = scmp.ne.s32.totalorder %s106_s23, %s1154_s2  ;;  %p1160_p4 = scmp.lt.s32.totalorder %s1154_s2, %s1154_s2 }
  0x49   :  { %p1161_p5 = por %p1160_p4, %p1159_p3 }
  0x4b   :  { %p1162_p6 = pnand %p1161_p5, %p1155_p2 }
  0x4d   :  { %1165 = shalt.err (!%p1162_p6)
}
  0x4e   :  { %111 = dma.hbm_to_vmem [thread:$0]  %s1386_s10, 1024, %s106_s23, [#allocation14], %s1199_s18, %s1199_s18, %s1200_s19  }
  0x4f   :  { %1186 = dma.done.wait [#allocation5], 128  }
  0x50   :  { %1187 = vsyncadd [#allocation5], 4294967168 }
  0x51   :  { %1188 = dma.done.wait [#allocation8], 1152  }
  0x52   :  { %1189 = vsyncadd [#allocation8], 4294966144 }
  0x53   :  { %1190 = dma.done.wait [#allocation11], 3072  }
  0x54   :  { %1191 = vsyncadd [#allocation11], 4294964224 }
  0x55   :  { %1192 = dma.done.wait [#allocation14], 2048  }
  0x56   :  { %1193 = vsyncadd [#allocation14], 4294965248  ;;  %v1207_v0 = vmov 0.0   ;;  %vm1208_vm0 = vmmov 0   ;;  %v1209_v1 = vmov 0   ;;  %v968_v2 = vld [vmem:[#allocation9 + $0x38] sm:$0xff]  }
  0x57   :  { %873 = vmatprep.subr.bf16.mxu0 %v1207_v0  ;;  %516 = vst [vmem:[#allocation3] sm:$0xff] %v1207_v0  ;;  %889 = vmatprep.mubr.msk.bf16.mxu0 %vm1208_vm0, %v1207_v0  ;;  %136 = vst [vmem:[#allocation2] sm:$0xf] %v1209_v1  ;;  %v969_v3 = vld [vmem:[#allocation9 + $0x30] sm:$0xff]   ;;  %v970_v4 = vld [vmem:[#allocation9 + $0x28] sm:$0xff]   ;;  %vm139_vm1 = vcmask 257024  }
  0x58   :  { %893 = vmatprep.subr.bf16.mxu1 %v1207_v0  ;;  %909 = vmatprep.mubr.msk.bf16.mxu1 %vm1208_vm0, %v1207_v0  ;;  %v137_v5 = vld [vmem:[#allocation4] sm:$0xff]  ;;  %v976_v7 = vld [vmem:[#allocation10 + $0x38] sm:$0xff]   ;;  %v971_v8 = vld [vmem:[#allocation9 + $0x20] sm:$0xff]   ;;  %vm518_vm2 = vcmask 130048   ;;  %s1210_s29 = smov [#allocation16]  }
  0x59   :  { %874 = vmatpush3.bf16.msra.mxu0 %v968_v2  ;;  %v138_v6 = vpack.c.bf16 %v137_v5, %v137_v5  ;;  %894 = vmatpush3.bf16.msra.mxu1 %v976_v7  ;;  %v977_v9 = vld [vmem:[#allocation10 + $0x30] sm:$0xff]   ;;  %v972_v10 = vld [vmem:[#allocation9 + $0x18] sm:$0xff]   ;;  %v978_v11 = vld [vmem:[#allocation10 + $0x28] sm:$0xff]   ;;  %s767_s30 = sshll.u32 %s1210_s29, 4  ;;  %s768_s30 = int_to_ptr.vmem [resolvable:$true] %s767_s30 }
  0x5a   :  { %875 = vmatprep.subr.bf16.mxu0 %v1207_v0  ;;  %895 = vmatprep.subr.bf16.mxu1 %v1207_v0  ;;  %v973_v12 = vld [vmem:[#allocation9 + $0x10] sm:$0xff]   ;;  %v979_v13 = vld [vmem:[#allocation10 + $0x20] sm:$0xff]   ;;  %v974_v14 = vld [vmem:[#allocation9 + $0x8] sm:$0xff]   ;;  %p1171_p8 = scmp.lt.s32.totalorder %s768_s30, %s768_s30 }
  0x5b   :  { %140 = vst.msk [vmem:[#allocation2] sm:$0xf] %vm139_vm1, %v138_v6  ;;  %v980_v15 = vld [vmem:[#allocation10 + $0x18] sm:$0xff]   ;;  %v975_v16 = vld [vmem:[#allocation9] sm:$0xff]   ;;  %v981_v17 = vld [vmem:[#allocation10 + $0x10] sm:$0xff]  }
  0x5c   :  { %v982_v19 = vld [vmem:[#allocation10 + $0x8] sm:$0xff]   ;;  %v983_v20 = vld [vmem:[#allocation10] sm:$0xff]   ;;  %v984_v21 = vld [vmem:[#allocation12 + $0x70] ss:$8 sps:$4 sm:$0xff]  }
  0x5d   :  { %876 = vmatpush3.bf16.msra.mxu0 %v969_v3  ;;  %896 = vmatpush3.bf16.msra.mxu1 %v977_v9  ;;  %v986_v22 = vld [vmem:[#allocation12 + $0x74] ss:$8 sps:$4 sm:$0xff]   ;;  %v989_v23 = vld [vmem:[#allocation12 + $0x64] ss:$8 sps:$4 sm:$0xff]   ;;  %v987_v24 = vld [vmem:[#allocation12 + $0x60] ss:$8 sps:$4 sm:$0xff]  }
  0x5e   :  { %877 = vmatprep.subr.bf16.mxu0 %v1207_v0  ;;  %897 = vmatprep.subr.bf16.mxu1 %v1207_v0  ;;  %v992_v25 = vld [vmem:[#allocation12 + $0x54] ss:$8 sps:$4 sm:$0xff]   ;;  %v990_v26 = vld [vmem:[#allocation12 + $0x50] ss:$8 sps:$4 sm:$0xff]   ;;  %v995_v27 = vld [vmem:[#allocation12 + $0x44] ss:$8 sps:$4 sm:$0xff]  }
  0x5f   :  { %v993_v28 = vld [vmem:[#allocation12 + $0x40] ss:$8 sps:$4 sm:$0xff]   ;;  %v998_v29 = vld [vmem:[#allocation12 + $0x34] ss:$8 sps:$4 sm:$0xff]   ;;  %v996_v30 = vld [vmem:[#allocation12 + $0x30] ss:$8 sps:$4 sm:$0xff]  }
  0x60   :  { %v1001_v31 = vld [vmem:[#allocation12 + $0x24] ss:$8 sps:$4 sm:$0xff]   ;;  %v999_v32 = vld [vmem:[#allocation12 + $0x20] ss:$8 sps:$4 sm:$0xff]   ;;  %v1004_v33 = vld [vmem:[#allocation12 + $0x14] ss:$8 sps:$4 sm:$0xff]  }
  0x61   :  { %878 = vmatpush3.bf16.msra.mxu0 %v970_v4  ;;  %898 = vmatpush3.bf16.msra.mxu1 %v978_v11  ;;  %v1002_v34 = vld [vmem:[#allocation12 + $0x10] ss:$8 sps:$4 sm:$0xff]   ;;  %v783_v35 = vld [vmem:[%s1379_s3] ss:$0 sm:$0xff]  ;;  %v1005_v44 = vld [vmem:[#allocation12] ss:$8 sps:$4 sm:$0xff]   ;;  %v385_v4 = vlaneseq }
  0x62   :  { %879 = vmatprep.subr.bf16.mxu0 %v1207_v0  ;;  %899 = vmatprep.subr.bf16.mxu1 %v1207_v0  ;;  %v141_v18 = vld [vmem:[#allocation2] sm:$0xf]  ;;  %v1008_v45 = vld [vmem:[#allocation13 + $0x38] sm:$0xff]   ;;  %v1009_v53 = vld [vmem:[#allocation13 + $0x30] sm:$0xff]  }
  0x63   :  { %v1007_v43 = vld [vmem:[#allocation12 + $0x4] ss:$8 sps:$4 sm:$0xff]   ;;  %v1012_v56 = vld [vmem:[#allocation13 + $0x18] sm:$0xff]   ;;  %v1013_v58 = vld [vmem:[#allocation13 + $0x10] sm:$0xff]   ;;  %v386_v5 = vshrl.u32 %v385_v4, 7 }
  0x64   :  { %v792_v46 = vld [vmem:[%s1381_s5] ss:$0 sm:$0xff]  ;;  %v1010_v54 = vld [vmem:[#allocation13 + $0x28] sm:$0xff]   ;;  %v517_v57 = vld [vmem:[#allocation7] sm:$0xff] }
  0x65   :  { %880 = vmatpush3.bf16.msra.mxu0 %v971_v8  ;;  %900 = vmatpush3.bf16.msra.mxu1 %v979_v13  ;;  %v1011_v55 = vld [vmem:[#allocation13 + $0x20] sm:$0xff]   ;;  %519 = vst.msk [vmem:[#allocation3] sm:$0xff] %vm518_vm2, %v517_v57  ;;  %v1014_v59 = vld [vmem:[#allocation13 + $0x8] sm:$0xff]   ;;  %v1016_v61 = vld [vmem:[#allocation15 + $0x38] sm:$0xff]   ;;  %v387_v6 = vsub.s32 0, %v386_v5  ;;  %v391_v7 = vsub.s32 1, %v386_v5 }
  0x66   :  { %881 = vmatprep.subr.bf16.mxu0 %v1207_v0  ;;  %901 = vmatprep.subr.bf16.mxu1 %v1207_v0  ;;  %v1015_v60 = vld [vmem:[#allocation13] sm:$0xff]   ;;  %v1017_v62 = vld [vmem:[#allocation15 + $0x30] sm:$0xff]   ;;  %v1018_v63 = vld [vmem:[#allocation15 + $0x28] sm:$0xff]  }
  0x67   :  { %v1020_v2 = vld [vmem:[#allocation15 + $0x18] sm:$0xff]   ;;  %v1021_v3 = vld [vmem:[#allocation15 + $0x10] sm:$0xff]   ;;  %v383_v8 = vld [vmem:[%s1383_s7] sm:$0x3] }
  0x68   :  { %v388_v9 = vrot.slane %v383_v8, %v387_v6 }
  0x69   :  { %882 = vmatpush3.bf16.msra.mxu0 %v972_v10  ;;  %902 = vmatpush3.bf16.msra.mxu1 %v980_v15  ;;  %v392_v10 = vrot.slane %v383_v8, %v391_v7 }
  0x6a   :  { %883 = vmatprep.subr.bf16.mxu0 %v1207_v0  ;;  %903 = vmatprep.subr.bf16.mxu1 %v1207_v0 }
  0x6d   :  { %884 = vmatpush3.bf16.msra.mxu0 %v973_v12  ;;  %904 = vmatpush3.bf16.msra.mxu1 %v981_v17 }
  0x6e   :  { %885 = vmatprep.subr.bf16.mxu0 %v1207_v0  ;;  %905 = vmatprep.subr.bf16.mxu1 %v1207_v0 }
  0x71   :  { %886 = vmatpush3.bf16.msra.mxu0 %v974_v14  ;;  %906 = vmatpush3.bf16.msra.mxu1 %v982_v19  ;;  %v520_v19 = vld [vmem:[#allocation3] sm:$0xff] }
  0x72   :  { %887 = vmatprep.subr.bf16.mxu0 %v1207_v0  ;;  %907 = vmatprep.subr.bf16.mxu1 %v1207_v0 }
  0x75   :  { %888 = vmatpush3.bf16.msra.mxu0 %v975_v16  ;;  %908 = vmatpush3.bf16.msra.mxu1 %v983_v20 }
  0x76   :  { %913 = vmatprep.subr.bf16.mxu1 %v1207_v0  ;;  %475 = vmatprep.subr.bf16.mxu0 %v986_v22 }
  0x78   :  { %890 = vmatmul.mubr.bf16.vlgmr.msra.gmra.mxu0 %v141_v18 }
  0x79   :  { %507 = vmatprep.mubr.bf16.mxu0 %v1209_v1  ;;  %476 = vmatpush1.bf16.msra.mxu0 %v984_v21  ;;  %v1019_v1 = vld [vmem:[#allocation15 + $0x20] sm:$0xff]  }
  0x7a   :  { %477 = vmatprep.subr.bf16.mxu0 %v989_v23 }
  0x7d   :  { %478 = vmatpush1.bf16.msra.mxu0 %v987_v24  ;;  %v1022_v24 = vld [vmem:[#allocation15 + $0x8] sm:$0xff]  }
  0x7e   :  { %479 = vmatprep.subr.bf16.mxu0 %v992_v25  ;;  %v1023_v25 = vld [vmem:[#allocation15] sm:$0xff]  }
  0x81   :  { %480 = vmatpush1.bf16.msra.mxu0 %v990_v26  ;;  %v817_v26 = vld [vmem:[%s1385_s9] ss:$0 sm:$0xff]  ;;  %s1166_s9 = scalar_lea.vmem %s768_s30, 64 }
  0x82   :  { %481 = vmatprep.subr.bf16.mxu0 %v995_v27  ;;  %p1167_p7 = scmp.ne.s32.totalorder %s768_s30, %s1166_s9  ;;  %p1172_p9 = scmp.lt.s32.totalorder %s1166_s9, %s1166_s9 }
  0x84   :  { %p1173_p10 = por %p1172_p9, %p1171_p8 }
  0x85   :  { %482 = vmatpush1.bf16.msra.mxu0 %v993_v28 }
  0x86   :  { %483 = vmatprep.subr.bf16.mxu0 %v998_v29  ;;  %p1174_p11 = pnand %p1173_p10, %p1167_p7 }
  0x89   :  { %484 = vmatpush1.bf16.msra.mxu0 %v996_v30 }
  0x8a   :  { %485 = vmatprep.subr.bf16.mxu0 %v1001_v31 }
  0x8d   :  { %486 = vmatpush1.bf16.msra.mxu0 %v999_v32 }
  0x8e   :  { %487 = vmatprep.subr.bf16.mxu0 %v1004_v33 }
  0x91   :  { %488 = vmatpush1.bf16.msra.mxu0 %v1002_v34  ;;  %v826_v34 = vld [vmem:[%s1387_s11] ss:$0 sm:$0xff] }
  0x92   :  { %489 = vmatprep.subr.bf16.mxu0 %v1007_v43 }
  0x95   :  { %490 = vmatpush1.bf16.msra.mxu0 %v1005_v44 }
  0x96   :  { %933 = vmatprep.subr.bf16.mxu0 %v1207_v0 }
 0x138   :  { %v247_v36 = vpop.f32.mrf.mxu0 }
 0x139   :  { %v248_v37 = vadd.f32 %v783_v35, %v247_v36 }
 0x13a   :  { %v891_v38 = vpop.f32.mrf.mxu0 }
 0x13b   :  { %v253_v39 = vmax.f32 %v248_v37, 0.0 }
 0x13c   :  { %v250_v40 = vpop.f32.mrf.mxu0 }
 0x13d   :  { %v254_v41 = vpack.c.bf16 %v253_v39, %v253_v39 }
 0x13e   :  { %v892_v42 = vpop.f32.mrf.mxu0 }
 0x13f   :  { %910 = vmatmul.mubr.bf16.vlgmr.msra.gmra.mxu1 %v254_v41 }
 0x140   :  { %929 = vmatprep.mubr.msk.bf16.mxu1 %vm1208_vm0, %v1207_v0  ;;  %914 = vmatpush3.bf16.msra.mxu1 %v1008_v45 }
 0x141   :  { %915 = vmatprep.subr.bf16.mxu1 %v1207_v0 }
 0x144   :  { %916 = vmatpush3.bf16.msra.mxu1 %v1009_v53 }
 0x145   :  { %917 = vmatprep.subr.bf16.mxu1 %v1207_v0 }
 0x148   :  { %918 = vmatpush3.bf16.msra.mxu1 %v1010_v54 }
 0x149   :  { %919 = vmatprep.subr.bf16.mxu1 %v1207_v0 }
 0x14c   :  { %920 = vmatpush3.bf16.msra.mxu1 %v1011_v55 }
 0x14d   :  { %921 = vmatprep.subr.bf16.mxu1 %v1207_v0 }
 0x150   :  { %922 = vmatpush3.bf16.msra.mxu1 %v1012_v56 }
 0x151   :  { %923 = vmatprep.subr.bf16.mxu1 %v1207_v0 }
 0x154   :  { %924 = vmatpush3.bf16.msra.mxu1 %v1013_v58 }
 0x155   :  { %925 = vmatprep.subr.bf16.mxu1 %v1207_v0 }
 0x158   :  { %926 = vmatpush3.bf16.msra.mxu1 %v1014_v59 }
 0x159   :  { %927 = vmatprep.subr.bf16.mxu1 %v1207_v0 }
 0x15c   :  { %928 = vmatpush3.bf16.msra.mxu1 %v1015_v60 }
 0x1ff   :  { %v360_v47 = vpop.f32.mrf.mxu1 }
 0x200   :  { %v361_v48 = vadd.f32 %v792_v46, %v360_v47 }
 0x201   :  { %v911_v49 = vpop.f32.mrf.mxu1 }
 0x202   :  { %v366_v50 = vpack.c.bf16 %v361_v48, %v361_v48 }
 0x203   :  { %v363_v51 = vpop.f32.mrf.mxu1 }
 0x204   :  { %508 = vmatmul.mubr.bf16.vlgmr.msra.gmra.mxu0 %v366_v50 }
 0x205   :  { %v912_v52 = vpop.f32.mrf.mxu1  ;;  %949 = vmatprep.mubr.msk.bf16.mxu0 %vm1208_vm0, %v1207_v0  ;;  %934 = vmatpush3.bf16.msra.mxu0 %v1016_v61 }
 0x206   :  { %935 = vmatprep.subr.bf16.mxu0 %v1207_v0 }
 0x209   :  { %936 = vmatpush3.bf16.msra.mxu0 %v1017_v62 }
 0x20a   :  { %937 = vmatprep.subr.bf16.mxu0 %v1207_v0 }
 0x20d   :  { %938 = vmatpush3.bf16.msra.mxu0 %v1018_v63 }
 0x20e   :  { %939 = vmatprep.subr.bf16.mxu0 %v1207_v0 }
 0x211   :  { %940 = vmatpush3.bf16.msra.mxu0 %v1019_v1 }
 0x212   :  { %941 = vmatprep.subr.bf16.mxu0 %v1207_v0 }
 0x215   :  { %942 = vmatpush3.bf16.msra.mxu0 %v1020_v2 }
 0x216   :  { %943 = vmatprep.subr.bf16.mxu0 %v1207_v0 }
 0x219   :  { %944 = vmatpush3.bf16.msra.mxu0 %v1021_v3 }
 0x21a   :  { %945 = vmatprep.subr.bf16.mxu0 %v1207_v0 }
 0x21d   :  { %946 = vmatpush3.bf16.msra.mxu0 %v1022_v24 }
 0x21e   :  { %947 = vmatprep.subr.bf16.mxu0 %v1207_v0 }
 0x221   :  { %948 = vmatpush3.bf16.msra.mxu0 %v1023_v25 }
 0x2c4   :  { %v509_v11 = vpop.f32.mrf.mxu0 }
 0x2c5   :  { %v510_v13 = vadd.f32 %v509_v11, %v388_v9 }
 0x2c6   :  { %v511_v12 = vpop.f32.mrf.mxu0 }
 0x2c7   :  { %v512_v14 = vadd.f32 %v511_v12, %v392_v10 }
 0x2c8   :  { %v513_v15 = vpop.f32.mrf.mxu0 }
 0x2c9   :  { %v521_v16 = vmul.f32 1.442695, %v512_v14  ;;  %v836_v17 = vpack.c.bf16 %v512_v14, %v510_v13 }
 0x2ca   :  { %v514_v18 = vpop.f32.mrf.mxu0 }
 0x2cb   :  { %1024 = vpow2.f32 %v521_v16  ;;  %760 = vst [vmem:[%s1389_s13] sm:$0xff] %v836_v17 }
 0x2d8   :  { %v1025_v20 = vpop.eup %1024 }
 0x2d9   :  { %v523_v21 = vmul.f32 %v1025_v20, %v520_v19 }
 0x2db   :  { %v524_v22 = vadd.f32 %v523_v21, %v510_v13 }
 0x2dd   :  { %v525_v23 = vpack.c.bf16 %v524_v22, %v524_v22 }
 0x2df   :  { %930 = vmatmul.mubr.bf16.vlgmr.msra.gmra.mxu1 %v525_v23 }
 0x39f   :  { %v631_v27 = vpop.f32.mrf.mxu1 }
 0x3a0   :  { %v632_v28 = vadd.f32 %v817_v26, %v631_v27 }
 0x3a1   :  { %v931_v29 = vpop.f32.mrf.mxu1 }
 0x3a2   :  { %v637_v30 = vmax.f32 %v632_v28, 0.0 }
 0x3a3   :  { %v634_v31 = vpop.f32.mrf.mxu1 }
 0x3a4   :  { %v638_v32 = vpack.c.bf16 %v637_v30, %v637_v30 }
 0x3a5   :  { %v932_v33 = vpop.f32.mrf.mxu1 }
 0x3a6   :  { %950 = vmatmul.mubr.bf16.vlgmr.msra.gmra.mxu0 %v638_v32 }
 0x466   :  { %v744_v35 = vpop.f32.mrf.mxu0 }
 0x467   :  { %v745_v0 = vadd.f32 %v826_v34, %v744_v35 }
 0x468   :  { %v951_v36 = vpop.f32.mrf.mxu0 }
 0x469   :  { %v750_v37 = vpack.c.bf16 %v745_v0, %v745_v0 }
 0x46a   :  { %v747_v38 = vpop.f32.mrf.mxu0 }
 0x46b   :  { %751 = vst [vmem:[#allocation16] sm:$0xf] %v750_v37 }
 0x46c   :  { %v952_v39 = vpop.f32.mrf.mxu0 }
 0x46d   :  { %1177 = shalt.err (!%p1174_p11)
}
 0x46e   :  { %770 = dma.vmem_to_hbm [thread:$0]  %s768_s30, 64, %s1388_s12, [#allocation6]  }
 0x46f   :  { %1194 = dma.done.wait [#allocation6], 64  }
 0x470   :  { %1195 = vsyncadd [#allocation6], 4294967232 }
 0x471   :  { %778 = vsyncpa [#allocation5], 1 }
 0x472   :  { %779 = vsyncpa [#allocation8], 1 }
 0x473   :  { %780 = vsyncpa [#allocation11], 1 }
 0x474   :  { %781 = vsyncpa [#allocation14], 1 }
 0x475   :  { %782 = vsyncpa [#allocation6], 1 }

// kernel: vae_forward.1
= control target key start
LH: loop header
LB: loop body
LE: loop exit
PB: predicated region body
PF: predicated region fallthrough
CT: control target
= control target key end

     0   :  { %19 = vsyncpa [#allocation5], 0  ;;  %s1376_s0 = inlined_call_operand.hbm [shape: f32[8,32], index: 0, kind: input, shape index: {}]   ;;  %s1377_s1 = inlined_call_operand.hbm [shape: f32[8,16], index: 1, kind: input, shape index: {}]   ;;  %s1378_s2 = inlined_call_operand.hbm [shape: bf16[128,128], index: 2, kind: input, shape index: {}]   ;;  %s1379_s3 = inlined_call_operand.vmem [shape: f32[1,128], index: 3, kind: input, shape index: {}]   ;;  %s1380_s4 = inlined_call_operand.hbm [shape: bf16[128,128], index: 4, kind: input, shape index: {}]   ;;  %s1381_s5 = inlined_call_operand.vmem [shape: f32[1,128], index: 5, kind: input, shape index: {}]   ;;  %s1382_s6 = inlined_call_operand.hbm [shape: bf16[128,256], index: 6, kind: input, shape index: {}]   ;;  %s1383_s7 = inlined_call_operand.vmem [shape: f32[1,256], index: 7, kind: input, shape index: {}]   ;;  %s1384_s8 = inlined_call_operand.hbm [shape: bf16[128,128], index: 8, kind: input, shape index: {}]   ;;  %s1385_s9 = inlined_call_operand.vmem [shape: f32[1,128], index: 9, kind: input, shape index: {}]   ;;  %s1386_s10 = inlined_call_operand.hbm [shape: bf16[128,128], index: 10, kind: input, shape index: {}]   ;;  %s1387_s11 = inlined_call_operand.vmem [shape: f32[1,128], index: 11, kind: input, shape index: {}]   ;;  %s1388_s12 = inlined_call_operand.hbm [shape: bf16[8,128], index: 12, kind: output, shape index: {0}]   ;;  %s1389_s13 = inlined_call_operand.vmem [shape: bf16[8,256], index: 13, kind: output, shape index: {1}]  }
   0x1   :  { %20 = vsyncpa [#allocation8], 0 }
   0x2   :  { %21 = vsyncpa [#allocation11], 0 }
   0x3   :  { %22 = vsyncpa [#allocation14], 0 }
   0x4   :  { %23 = vsyncpa [#allocation6], 0  ;;  %s1196_s25 = smov [#allocation7]  }
   0x5   :  { %s40_s26 = sshll.u32 %s1196_s25, 4  ;;  %s41_s26 = int_to_ptr.vmem [resolvable:$true] %s40_s26 }
   0x6   :  { %s1034_s27 = scalar_lea.vmem %s41_s26, 128  ;;  %p1039_p1 = scmp.lt.s32.totalorder %s41_s26, %s41_s26 }
   0x7   :  { %p1035_p0 = scmp.ne.s32.totalorder %s41_s26, %s1034_s27  ;;  %p1040_p2 = scmp.lt.s32.totalorder %s1034_s27, %s1034_s27 }
   0x9   :  { %p1041_p3 = por %p1040_p2, %p1039_p1 }
   0xb   :  { %p1042_p4 = pnand %p1041_p3, %p1035_p0 }
   0xd   :  { %1045 = shalt.err (!%p1042_p4)
}
   0xe   :  { %43 = dma.hbm_to_vmem [thread:$0]  %s1377_s1, 128, %s41_s26, [#allocation8]  }
   0xf   :  { %s1197_s30 = smov [#allocation10]   ;;  %s1198_s15 = smov [#allocation13]  }
  0x10   :  { %s63_s14 = sshll.u32 %s1197_s30, 4  ;;  %s91_s16 = sshll.u32 %s1198_s15, 4  ;;  %s64_s14 = int_to_ptr.vmem [resolvable:$true] %s63_s14  ;;  %s92_s16 = int_to_ptr.vmem [resolvable:$true] %s91_s16 }
  0x11   :  { %s1054_s17 = scalar_lea.vmem %s64_s14, 1024  ;;  %p1059_p6 = scmp.lt.s32.totalorder %s64_s14, %s64_s14 }
  0x12   :  { %p1055_p5 = scmp.ne.s32.totalorder %s64_s14, %s1054_s17  ;;  %p1060_p7 = scmp.lt.s32.totalorder %s1054_s17, %s1054_s17 }
  0x14   :  { %p1061_p8 = por %p1060_p7, %p1059_p6 }
  0x16   :  { %p1062_p9 = pnand %p1061_p8, %p1055_p5 }
  0x18   :  { %1065 = shalt.err (!%p1062_p9)
}
  0x19   :  { %s1199_s18 = smov 64   ;;  %s1200_s19 = smov 4  }
  0x1a   :  { %69 = dma.hbm_to_vmem [thread:$0]  %s1380_s4, 1024, %s64_s14, [#allocation11], %s1199_s18, %s1199_s18, %s1200_s19  }
  0x1b   :  { %s1074_s1 = scalar_lea.vmem %s92_s16, 1024  ;;  %p1079_p11 = scmp.lt.s32.totalorder %s92_s16, %s92_s16 }
  0x1c   :  { %p1075_p10 = scmp.ne.s32.totalorder %s92_s16, %s1074_s1  ;;  %p1080_p12 = scmp.lt.s32.totalorder %s1074_s1, %s1074_s1 }
  0x1e   :  { %p1081_p13 = por %p1080_p12, %p1079_p11 }
  0x20   :  { %p1082_p0 = pnand %p1081_p13, %p1075_p10 }
  0x22   :  { %1085 = shalt.err (!%p1082_p0)
}
  0x23   :  { %97 = dma.hbm_to_vmem [thread:$0]  %s1384_s8, 1024, %s92_s16, [#allocation14], %s1199_s18, %s1199_s18, %s1200_s19  }
  0x24   :  { %s1201_s24 = smov [#allocation4]   ;;  %s1202_s26 = smov [#allocation9]  }
  0x25   :  { %s30_s25 = sshll.u32 %s1201_s24, 4  ;;  %s49_s4 = sshll.u32 %s1202_s26, 4  ;;  %s31_s25 = int_to_ptr.vmem [resolvable:$true] %s30_s25  ;;  %s50_s4 = int_to_ptr.vmem [resolvable:$true] %s49_s4 }
  0x26   :  { %s1094_s27 = scalar_lea.vmem %s31_s25, 128  ;;  %p1099_p2 = scmp.lt.s32.totalorder %s31_s25, %s31_s25 }
  0x27   :  { %p1095_p1 = scmp.ne.s32.totalorder %s31_s25, %s1094_s27  ;;  %p1100_p3 = scmp.lt.s32.totalorder %s1094_s27, %s1094_s27 }
  0x29   :  { %p1101_p4 = por %p1100_p3, %p1099_p2 }
  0x2b   :  { %p1102_p5 = pnand %p1101_p4, %p1095_p1 }
  0x2d   :  { %1105 = shalt.err (!%p1102_p5)
}
  0x2e   :  { %33 = dma.hbm_to_vmem [thread:$0]  %s1376_s0, 128, %s31_s25, [#allocation5]  }
  0x2f   :  { %s1114_s30 = scalar_lea.vmem %s50_s4, 1024  ;;  %p1119_p7 = scmp.lt.s32.totalorder %s50_s4, %s50_s4 }
  0x30   :  { %p1115_p6 = scmp.ne.s32.totalorder %s50_s4, %s1114_s30  ;;  %p1120_p8 = scmp.lt.s32.totalorder %s1114_s30, %s1114_s30 }
  0x32   :  { %p1121_p9 = por %p1120_p8, %p1119_p7 }
  0x34   :  { %p1122_p10 = pnand %p1121_p9, %p1115_p6 }
  0x36   :  { %1125 = shalt.err (!%p1122_p10)
}
  0x37   :  { %55 = dma.hbm_to_vmem [thread:$0]  %s1378_s2, 1024, %s50_s4, [#allocation8], %s1199_s18, %s1199_s18, %s1200_s19  }
  0x38   :  { %s1203_s15 = smov [#allocation12]  }
  0x39   :  { %s77_s16 = sshll.u32 %s1203_s15, 4  ;;  %s78_s16 = int_to_ptr.vmem [resolvable:$true] %s77_s16 }
  0x3a   :  { %s1134_s17 = scalar_lea.vmem %s78_s16, 2048  ;;  %p1139_p12 = scmp.lt.s32.totalorder %s78_s16, %s78_s16 }
  0x3b   :  { %p1135_p11 = scmp.ne.s32.totalorder %s78_s16, %s1134_s17  ;;  %p1140_p13 = scmp.lt.s32.totalorder %s1134_s17, %s1134_s17 }
  0x3d   :  { %p1141_p0 = por %p1140_p13, %p1139_p12 }
  0x3f   :  { %p1142_p1 = pnand %p1141_p0, %p1135_p11 }
  0x41   :  { %1145 = shalt.err (!%p1142_p1)
}
  0x42   :  { %s1204_s0 = smov 128   ;;  %s1205_s20 = smov 8  }
  0x43   :  { %83 = dma.hbm_to_vmem [thread:$0]  %s1382_s6, 2048, %s78_s16, [#allocation11], %s1204_s0, %s1204_s0, %s1205_s20  }
  0x44   :  { %s1206_s22 = smov [#allocation15]  }
  0x45   :  { %s105_s23 = sshll.u32 %s1206_s22, 4  ;;  %s106_s23 = int_to_ptr.vmem [resolvable:$true] %s105_s23 }
  0x46   :  { %s1154_s2 = scalar_lea.vmem %s106_s23, 1024  ;;  %p1159_p3 = scmp.lt.s32.totalorder %s106_s23, %s106_s23 }
  0x47   :  { %p1155_p2 = scmp.ne.s32.totalorder %s106_s23, %s1154_s2  ;;  %p1160_p4 = scmp.lt.s32.totalorder %s1154_s2, %s1154_s2 }
  0x49   :  { %p1161_p5 = por %p1160_p4, %p1159_p3 }
  0x4b   :  { %p1162_p6 = pnand %p1161_p5, %p1155_p2 }
  0x4d   :  { %1165 = shalt.err (!%p1162_p6)
}
  0x4e   :  { %111 = dma.hbm_to_vmem [thread:$0]  %s1386_s10, 1024, %s106_s23, [#allocation14], %s1199_s18, %s1199_s18, %s1200_s19  }
  0x4f   :  { %1186 = dma.done.wait [#allocation5], 128  }
  0x50   :  { %1187 = vsyncadd [#allocation5], 4294967168 }
  0x51   :  { %1188 = dma.done.wait [#allocation8], 1152  }
  0x52   :  { %1189 = vsyncadd [#allocation8], 4294966144 }
  0x53   :  { %1190 = dma.done.wait [#allocation11], 3072  }
  0x54   :  { %1191 = vsyncadd [#allocation11], 4294964224 }
  0x55   :  { %1192 = dma.done.wait [#allocation14], 2048  }
  0x56   :  { %1193 = vsyncadd [#allocation14], 4294965248  ;;  %v1207_v0 = vmov 0.0   ;;  %vm1208_vm0 = vmmov 0   ;;  %v1209_v1 = vmov 0   ;;  %v968_v2 = vld [vmem:[#allocation9 + $0x38] sm:$0xff]  }
  0x57   :  { %873 = vmatprep.subr.bf16.mxu0 %v1207_v0  ;;  %516 = vst [vmem:[#allocation3] sm:$0xff] %v1207_v0  ;;  %889 = vmatprep.mubr.msk.bf16.mxu0 %vm1208_vm0, %v1207_v0  ;;  %136 = vst [vmem:[#allocation2] sm:$0xf] %v1209_v1  ;;  %v969_v3 = vld [vmem:[#allocation9 + $0x30] sm:$0xff]   ;;  %v970_v4 = vld [vmem:[#allocation9 + $0x28] sm:$0xff]   ;;  %vm139_vm1 = vcmask 257024  }
  0x58   :  { %893 = vmatprep.subr.bf16.mxu1 %v1207_v0  ;;  %909 = vmatprep.mubr.msk.bf16.mxu1 %vm1208_vm0, %v1207_v0  ;;  %v137_v5 = vld [vmem:[#allocation4] sm:$0xff]  ;;  %v976_v7 = vld [vmem:[#allocation10 + $0x38] sm:$0xff]   ;;  %v971_v8 = vld [vmem:[#allocation9 + $0x20] sm:$0xff]   ;;  %vm518_vm2 = vcmask 130048   ;;  %s1210_s29 = smov [#allocation16]  }
  0x59   :  { %874 = vmatpush3.bf16.msra.mxu0 %v968_v2  ;;  %v138_v6 = vpack.c.bf16 %v137_v5, %v137_v5  ;;  %894 = vmatpush3.bf16.msra.mxu1 %v976_v7  ;;  %v977_v9 = vld [vmem:[#allocation10 + $0x30] sm:$0xff]   ;;  %v972_v10 = vld [vmem:[#allocation9 + $0x18] sm:$0xff]   ;;  %v978_v11 = vld [vmem:[#allocation10 + $0x28] sm:$0xff]   ;;  %s767_s30 = sshll.u32 %s1210_s29, 4  ;;  %s768_s30 = int_to_ptr.vmem [resolvable:$true] %s767_s30 }
  0x5a   :  { %875 = vmatprep.subr.bf16.mxu0 %v1207_v0  ;;  %895 = vmatprep.subr.bf16.mxu1 %v1207_v0  ;;  %v973_v12 = vld [vmem:[#allocation9 + $0x10] sm:$0xff]   ;;  %v979_v13 = vld [vmem:[#allocation10 + $0x20] sm:$0xff]   ;;  %v974_v14 = vld [vmem:[#allocation9 + $0x8] sm:$0xff]   ;;  %p1171_p8 = scmp.lt.s32.totalorder %s768_s30, %s768_s30 }
  0x5b   :  { %140 = vst.msk [vmem:[#allocation2] sm:$0xf] %vm139_vm1, %v138_v6  ;;  %v980_v15 = vld [vmem:[#allocation10 + $0x18] sm:$0xff]   ;;  %v975_v16 = vld [vmem:[#allocation9] sm:$0xff]   ;;  %v981_v17 = vld [vmem:[#allocation10 + $0x10] sm:$0xff]  }
  0x5c   :  { %v982_v19 = vld [vmem:[#allocation10 + $0x8] sm:$0xff]   ;;  %v983_v20 = vld [vmem:[#allocation10] sm:$0xff]   ;;  %v984_v21 = vld [vmem:[#allocation12 + $0x70] ss:$8 sps:$4 sm:$0xff]  }
  0x5d   :  { %876 = vmatpush3.bf16.msra.mxu0 %v969_v3  ;;  %896 = vmatpush3.bf16.msra.mxu1 %v977_v9  ;;  %v986_v22 = vld [vmem:[#allocation12 + $0x74] ss:$8 sps:$4 sm:$0xff]   ;;  %v989_v23 = vld [vmem:[#allocation12 + $0x64] ss:$8 sps:$4 sm:$0xff]   ;;  %v987_v24 = vld [vmem:[#allocation12 + $0x60] ss:$8 sps:$4 sm:$0xff]  }
  0x5e   :  { %877 = vmatprep.subr.bf16.mxu0 %v1207_v0  ;;  %897 = vmatprep.subr.bf16.mxu1 %v1207_v0  ;;  %v992_v25 = vld [vmem:[#allocation12 + $0x54] ss:$8 sps:$4 sm:$0xff]   ;;  %v990_v26 = vld [vmem:[#allocation12 + $0x50] ss:$8 sps:$4 sm:$0xff]   ;;  %v995_v27 = vld [vmem:[#allocation12 + $0x44] ss:$8 sps:$4 sm:$0xff]  }
  0x5f   :  { %v993_v28 = vld [vmem:[#allocation12 + $0x40] ss:$8 sps:$4 sm:$0xff]   ;;  %v998_v29 = vld [vmem:[#allocation12 + $0x34] ss:$8 sps:$4 sm:$0xff]   ;;  %v996_v30 = vld [vmem:[#allocation12 + $0x30] ss:$8 sps:$4 sm:$0xff]  }
  0x60   :  { %v1001_v31 = vld [vmem:[#allocation12 + $0x24] ss:$8 sps:$4 sm:$0xff]   ;;  %v999_v32 = vld [vmem:[#allocation12 + $0x20] ss:$8 sps:$4 sm:$0xff]   ;;  %v1004_v33 = vld [vmem:[#allocation12 + $0x14] ss:$8 sps:$4 sm:$0xff]  }
  0x61   :  { %878 = vmatpush3.bf16.msra.mxu0 %v970_v4  ;;  %898 = vmatpush3.bf16.msra.mxu1 %v978_v11  ;;  %v1002_v34 = vld [vmem:[#allocation12 + $0x10] ss:$8 sps:$4 sm:$0xff]   ;;  %v783_v35 = vld [vmem:[%s1379_s3] ss:$0 sm:$0xff]  ;;  %v1005_v44 = vld [vmem:[#allocation12] ss:$8 sps:$4 sm:$0xff]   ;;  %v385_v4 = vlaneseq }
  0x62   :  { %879 = vmatprep.subr.bf16.mxu0 %v1207_v0  ;;  %899 = vmatprep.subr.bf16.mxu1 %v1207_v0  ;;  %v141_v18 = vld [vmem:[#allocation2] sm:$0xf]  ;;  %v1008_v45 = vld [vmem:[#allocation13 + $0x38] sm:$0xff]   ;;  %v1009_v53 = vld [vmem:[#allocation13 + $0x30] sm:$0xff]  }
  0x63   :  { %v1007_v43 = vld [vmem:[#allocation12 + $0x4] ss:$8 sps:$4 sm:$0xff]   ;;  %v1012_v56 = vld [vmem:[#allocation13 + $0x18] sm:$0xff]   ;;  %v1013_v58 = vld [vmem:[#allocation13 + $0x10] sm:$0xff]   ;;  %v386_v5 = vshrl.u32 %v385_v4, 7 }
  0x64   :  { %v792_v46 = vld [vmem:[%s1381_s5] ss:$0 sm:$0xff]  ;;  %v1010_v54 = vld [vmem:[#allocation13 + $0x28] sm:$0xff]   ;;  %v517_v57 = vld [vmem:[#allocation7] sm:$0xff] }
  0x65   :  { %880 = vmatpush3.bf16.msra.mxu0 %v971_v8  ;;  %900 = vmatpush3.bf16.msra.mxu1 %v979_v13  ;;  %v1011_v55 = vld [vmem:[#allocation13 + $0x20] sm:$0xff]   ;;  %519 = vst.msk [vmem:[#allocation3] sm:$0xff] %vm518_vm2, %v517_v57  ;;  %v1014_v59 = vld [vmem:[#allocation13 + $0x8] sm:$0xff]   ;;  %v1016_v61 = vld [vmem:[#allocation15 + $0x38] sm:$0xff]   ;;  %v387_v6 = vsub.s32 0, %v386_v5  ;;  %v391_v7 = vsub.s32 1, %v386_v5 }
  0x66   :  { %881 = vmatprep.subr.bf16.mxu0 %v1207_v0  ;;  %901 = vmatprep.subr.bf16.mxu1 %v1207_v0  ;;  %v1015_v60 = vld [vmem:[#allocation13] sm:$0xff]   ;;  %v1017_v62 = vld [vmem:[#allocation15 + $0x30] sm:$0xff]   ;;  %v1018_v63 = vld [vmem:[#allocation15 + $0x28] sm:$0xff]  }
  0x67   :  { %v1020_v2 = vld [vmem:[#allocation15 + $0x18] sm:$0xff]   ;;  %v1021_v3 = vld [vmem:[#allocation15 + $0x10] sm:$0xff]   ;;  %v383_v8 = vld [vmem:[%s1383_s7] sm:$0x3] }
  0x68   :  { %v388_v9 = vrot.slane %v383_v8, %v387_v6 }
  0x69   :  { %882 = vmatpush3.bf16.msra.mxu0 %v972_v10  ;;  %902 = vmatpush3.bf16.msra.mxu1 %v980_v15  ;;  %v392_v10 = vrot.slane %v383_v8, %v391_v7 }
  0x6a   :  { %883 = vmatprep.subr.bf16.mxu0 %v1207_v0  ;;  %903 = vmatprep.subr.bf16.mxu1 %v1207_v0 }
  0x6d   :  { %884 = vmatpush3.bf16.msra.mxu0 %v973_v12  ;;  %904 = vmatpush3.bf16.msra.mxu1 %v981_v17 }
  0x6e   :  { %885 = vmatprep.subr.bf16.mxu0 %v1207_v0  ;;  %905 = vmatprep.subr.bf16.mxu1 %v1207_v0 }
  0x71   :  { %886 = vmatpush3.bf16.msra.mxu0 %v974_v14  ;;  %906 = vmatpush3.bf16.msra.mxu1 %v982_v19  ;;  %v520_v19 = vld [vmem:[#allocation3] sm:$0xff] }
  0x72   :  { %887 = vmatprep.subr.bf16.mxu0 %v1207_v0  ;;  %907 = vmatprep.subr.bf16.mxu1 %v1207_v0 }
  0x75   :  { %888 = vmatpush3.bf16.msra.mxu0 %v975_v16  ;;  %908 = vmatpush3.bf16.msra.mxu1 %v983_v20 }
  0x76   :  { %913 = vmatprep.subr.bf16.mxu1 %v1207_v0  ;;  %475 = vmatprep.subr.bf16.mxu0 %v986_v22 }
  0x78   :  { %890 = vmatmul.mubr.bf16.vlgmr.msra.gmra.mxu0 %v141_v18 }
  0x79   :  { %507 = vmatprep.mubr.bf16.mxu0 %v1209_v1  ;;  %476 = vmatpush1.bf16.msra.mxu0 %v984_v21  ;;  %v1019_v1 = vld [vmem:[#allocation15 + $0x20] sm:$0xff]  }
  0x7a   :  { %477 = vmatprep.subr.bf16.mxu0 %v989_v23 }
  0x7d   :  { %478 = vmatpush1.bf16.msra.mxu0 %v987_v24  ;;  %v1022_v24 = vld [vmem:[#allocation15 + $0x8] sm:$0xff]  }
  0x7e   :  { %479 = vmatprep.subr.bf16.mxu0 %v992_v25  ;;  %v1023_v25 = vld [vmem:[#allocation15] sm:$0xff]  }
  0x81   :  { %480 = vmatpush1.bf16.msra.mxu0 %v990_v26  ;;  %v817_v26 = vld [vmem:[%s1385_s9] ss:$0 sm:$0xff]  ;;  %s1166_s9 = scalar_lea.vmem %s768_s30, 64 }
  0x82   :  { %481 = vmatprep.subr.bf16.mxu0 %v995_v27  ;;  %p1167_p7 = scmp.ne.s32.totalorder %s768_s30, %s1166_s9  ;;  %p1172_p9 = scmp.lt.s32.totalorder %s1166_s9, %s1166_s9 }
  0x84   :  { %p1173_p10 = por %p1172_p9, %p1171_p8 }
  0x85   :  { %482 = vmatpush1.bf16.msra.mxu0 %v993_v28 }
  0x86   :  { %483 = vmatprep.subr.bf16.mxu0 %v998_v29  ;;  %p1174_p11 = pnand %p1173_p10, %p1167_p7 }
  0x89   :  { %484 = vmatpush1.bf16.msra.mxu0 %v996_v30 }
  0x8a   :  { %485 = vmatprep.subr.bf16.mxu0 %v1001_v31 }
  0x8d   :  { %486 = vmatpush1.bf16.msra.mxu0 %v999_v32 }
  0x8e   :  { %487 = vmatprep.subr.bf16.mxu0 %v1004_v33 }
  0x91   :  { %488 = vmatpush1.bf16.msra.mxu0 %v1002_v34  ;;  %v826_v34 = vld [vmem:[%s1387_s11] ss:$0 sm:$0xff] }
  0x92   :  { %489 = vmatprep.subr.bf16.mxu0 %v1007_v43 }
  0x95   :  { %490 = vmatpush1.bf16.msra.mxu0 %v1005_v44 }
  0x96   :  { %933 = vmatprep.subr.bf16.mxu0 %v1207_v0 }
 0x138   :  { %v247_v36 = vpop.f32.mrf.mxu0 }
 0x139   :  { %v248_v37 = vadd.f32 %v783_v35, %v247_v36 }
 0x13a   :  { %v891_v38 = vpop.f32.mrf.mxu0 }
 0x13b   :  { %v253_v39 = vmax.f32 %v248_v37, 0.0 }
 0x13c   :  { %v250_v40 = vpop.f32.mrf.mxu0 }
 0x13d   :  { %v254_v41 = vpack.c.bf16 %v253_v39, %v253_v39 }
 0x13e   :  { %v892_v42 = vpop.f32.mrf.mxu0 }
 0x13f   :  { %910 = vmatmul.mubr.bf16.vlgmr.msra.gmra.mxu1 %v254_v41 }
 0x140   :  { %929 = vmatprep.mubr.msk.bf16.mxu1 %vm1208_vm0, %v1207_v0  ;;  %914 = vmatpush3.bf16.msra.mxu1 %v1008_v45 }
 0x141   :  { %915 = vmatprep.subr.bf16.mxu1 %v1207_v0 }
 0x144   :  { %916 = vmatpush3.bf16.msra.mxu1 %v1009_v53 }
 0x145   :  { %917 = vmatprep.subr.bf16.mxu1 %v1207_v0 }
 0x148   :  { %918 = vmatpush3.bf16.msra.mxu1 %v1010_v54 }
 0x149   :  { %919 = vmatprep.subr.bf16.mxu1 %v1207_v0 }
 0x14c   :  { %920 = vmatpush3.bf16.msra.mxu1 %v1011_v55 }
 0x14d   :  { %921 = vmatprep.subr.bf16.mxu1 %v1207_v0 }
 0x150   :  { %922 = vmatpush3.bf16.msra.mxu1 %v1012_v56 }
 0x151   :  { %923 = vmatprep.subr.bf16.mxu1 %v1207_v0 }
 0x154   :  { %924 = vmatpush3.bf16.msra.mxu1 %v1013_v58 }
 0x155   :  { %925 = vmatprep.subr.bf16.mxu1 %v1207_v0 }
 0x158   :  { %926 = vmatpush3.bf16.msra.mxu1 %v1014_v59 }
 0x159   :  { %927 = vmatprep.subr.bf16.mxu1 %v1207_v0 }
 0x15c   :  { %928 = vmatpush3.bf16.msra.mxu1 %v1015_v60 }
 0x1ff   :  { %v360_v47 = vpop.f32.mrf.mxu1 }
 0x200   :  { %v361_v48 = vadd.f32 %v792_v46, %v360_v47 }
 0x201   :  { %v911_v49 = vpop.f32.mrf.mxu1 }
 0x202   :  { %v366_v50 = vpack.c.bf16 %v361_v48, %v361_v48 }
 0x203   :  { %v363_v51 = vpop.f32.mrf.mxu1 }
 0x204   :  { %508 = vmatmul.mubr.bf16.vlgmr.msra.gmra.mxu0 %v366_v50 }
 0x205   :  { %v912_v52 = vpop.f32.mrf.mxu1  ;;  %949 = vmatprep.mubr.msk.bf16.mxu0 %vm1208_vm0, %v1207_v0  ;;  %934 = vmatpush3.bf16.msra.mxu0 %v1016_v61 }
 0x206   :  { %935 = vmatprep.subr.bf16.mxu0 %v1207_v0 }
 0x209   :  { %936 = vmatpush3.bf16.msra.mxu0 %v1017_v62 }
 0x20a   :  { %937 = vmatprep.subr.bf16.mxu0 %v1207_v0 }
 0x20d   :  { %938 = vmatpush3.bf16.msra.mxu0 %v1018_v63 }
 0x20e   :  { %939 = vmatprep.subr.bf16.mxu0 %v1207_v0 }
 0x211   :  { %940 = vmatpush3.bf16.msra.mxu0 %v1019_v1 }
 0x212   :  { %941 = vmatprep.subr.bf16.mxu0 %v1207_v0 }
 0x215   :  { %942 = vmatpush3.bf16.msra.mxu0 %v1020_v2 }
 0x216   :  { %943 = vmatprep.subr.bf16.mxu0 %v1207_v0 }
 0x219   :  { %944 = vmatpush3.bf16.msra.mxu0 %v1021_v3 }
 0x21a   :  { %945 = vmatprep.subr.bf16.mxu0 %v1207_v0 }
 0x21d   :  { %946 = vmatpush3.bf16.msra.mxu0 %v1022_v24 }
 0x21e   :  { %947 = vmatprep.subr.bf16.mxu0 %v1207_v0 }
 0x221   :  { %948 = vmatpush3.bf16.msra.mxu0 %v1023_v25 }
 0x2c4   :  { %v509_v11 = vpop.f32.mrf.mxu0 }
 0x2c5   :  { %v510_v13 = vadd.f32 %v509_v11, %v388_v9 }
 0x2c6   :  { %v511_v12 = vpop.f32.mrf.mxu0 }
 0x2c7   :  { %v512_v14 = vadd.f32 %v511_v12, %v392_v10 }
 0x2c8   :  { %v513_v15 = vpop.f32.mrf.mxu0 }
 0x2c9   :  { %v521_v16 = vmul.f32 1.442695, %v512_v14  ;;  %v836_v17 = vpack.c.bf16 %v512_v14, %v510_v13 }
 0x2ca   :  { %v514_v18 = vpop.f32.mrf.mxu0 }
 0x2cb   :  { %1024 = vpow2.f32 %v521_v16  ;;  %760 = vst [vmem:[%s1389_s13] sm:$0xff] %v836_v17 }
 0x2d8   :  { %v1025_v20 = vpop.eup %1024 }
 0x2d9   :  { %v523_v21 = vmul.f32 %v1025_v20, %v520_v19 }
 0x2db   :  { %v524_v22 = vadd.f32 %v523_v21, %v510_v13 }
 0x2dd   :  { %v525_v23 = vpack.c.bf16 %v524_v22, %v524_v22 }
 0x2df   :  { %930 = vmatmul.mubr.bf16.vlgmr.msra.gmra.mxu1 %v525_v23 }
 0x39f   :  { %v631_v27 = vpop.f32.mrf.mxu1 }
 0x3a0   :  { %v632_v28 = vadd.f32 %v817_v26, %v631_v27 }
 0x3a1   :  { %v931_v29 = vpop.f32.mrf.mxu1 }
 0x3a2   :  { %v637_v30 = vmax.f32 %v632_v28, 0.0 }
 0x3a3   :  { %v634_v31 = vpop.f32.mrf.mxu1 }
 0x3a4   :  { %v638_v32 = vpack.c.bf16 %v637_v30, %v637_v30 }
 0x3a5   :  { %v932_v33 = vpop.f32.mrf.mxu1 }
 0x3a6   :  { %950 = vmatmul.mubr.bf16.vlgmr.msra.gmra.mxu0 %v638_v32 }
 0x466   :  { %v744_v35 = vpop.f32.mrf.mxu0 }
 0x467   :  { %v745_v0 = vadd.f32 %v826_v34, %v744_v35 }
 0x468   :  { %v951_v36 = vpop.f32.mrf.mxu0 }
 0x469   :  { %v750_v37 = vpack.c.bf16 %v745_v0, %v745_v0 }
 0x46a   :  { %v747_v38 = vpop.f32.mrf.mxu0 }
 0x46b   :  { %751 = vst [vmem:[#allocation16] sm:$0xf] %v750_v37 }
 0x46c   :  { %v952_v39 = vpop.f32.mrf.mxu0 }
 0x46d   :  { %1177 = shalt.err (!%p1174_p11)
}
 0x46e   :  { %770 = dma.vmem_to_hbm [thread:$0]  %s768_s30, 64, %s1388_s12, [#allocation6]  }
 0x46f   :  { %1194 = dma.done.wait [#allocation6], 64  }
 0x470   :  { %1195 = vsyncadd [#allocation6], 4294967232 }
 0x471   :  { %778 = vsyncpa [#allocation5], 1 }
 0x472   :  { %779 = vsyncpa [#allocation8], 1 }
 0x473   :  { %780 = vsyncpa [#allocation11], 1 }
 0x474   :  { %781 = vsyncpa [#allocation14], 1 }
 0x475   :  { %782 = vsyncpa [#allocation6], 1 }

</bundles_post_ra>
